<compile_context>
chip_gen: v6e
topology: v6e:2x2x1
jax: 0.10.0
libtpu: 0.0.40
codegen_flags: <defaults>
</compile_context>

<pallas_src>
import functools

import jax
import jax.numpy as jnp
from jax import lax
from jax.experimental import pallas as pl
from jax.experimental.pallas import tpu as pltpu

LANE = 128
_PREC = jax.lax.Precision.HIGHEST


def _round_up(n, m):
    return ((n + m - 1) // m) * m


def _pick_batch_tile(b_pad, bt_max):
    """Largest tile <= bt_max (by halving) that is a multiple of 128 and divides b_pad."""
    t = bt_max
    while t > LANE:
        if t % LANE == 0 and b_pad % t == 0:
            return t
        t //= 2
    return LANE


def _pick_chunk(bt_eff, max_chunk=256):
    """Inner lane-chunk size: caps vreg pressure of the (chunk, 3) input slab."""
    c = min(max_chunk, bt_eff)
    while bt_eff % c != 0:
        c //= 2
    return max(c, LANE)


def _batch_axis_semantics(num_steps):
    kind = jax.devices()[0].device_kind.lower()
    if num_steps >= 2 and "7" in kind:      # v7x: 2 TensorCores per chip
        return (pltpu.CORE_PARALLEL,)
    return ("parallel",)                    # measured no-op on 1-TC chips, but safe


def _mlp_kernel(x_ref,
                w1_ref, b1_ref, w2_ref, b2_ref, w3_ref, b3_ref, w4_ref, b4_ref,
                o_ref, *, chunk, n_chunks):
    """One bt_eff-wide batch tile.  Activations are feature-major
    (features, chunk) so the batch dimension fills the 128-lane axis."""

    def body(c, carry):
        base = pl.multiple_of(c * chunk, chunk)
        x = x_ref[pl.ds(base, chunk), :]                          # (chunk, 3) batch-major

        # Layer 1: contract the 3-wide feature axis of BOTH operands so the
        # batch->feature transpose is absorbed into the MXU contraction.
        h = lax.dot_general(w1_ref[...], x, (((1,), (1,)), ((), ())),
                            preferred_element_type=jnp.float32,
                            precision=_PREC)                      # (32, chunk)
        h = jnp.maximum(h + b1_ref[...], 0.0)

        h = jnp.dot(w2_ref[...], h, preferred_element_type=jnp.float32,
                    precision=_PREC)                              # (64, chunk)
        h = jnp.maximum(h + b2_ref[...], 0.0)

        h = jnp.dot(w3_ref[...], h, preferred_element_type=jnp.float32,
                    precision=_PREC)                              # (32, chunk)
        h = jnp.maximum(h + b3_ref[...], 0.0)

        o = jnp.dot(w4_ref[...], h, preferred_element_type=jnp.float32,
                    precision=_PREC)                              # (3, chunk)
        o_ref[:, pl.ds(base, chunk)] = (o + b4_ref[...]).astype(o_ref.dtype)
        return carry

    lax.fori_loop(0, n_chunks, body, 0, unroll=True)


def _stage_params(params):
    """Weights in PyTorch (out, in) layout, biases as (out, 1) columns so they
    broadcast over the lane (batch) axis.  Nothing is padded."""
    staged = []
    for w, b in params:
        staged.append(w.astype(jnp.float32))
        staged.append(b.astype(jnp.float32).reshape(-1, 1))
    return tuple(staged)


def _xla_mlp(x, params):
    h = x
    for i, (w, b) in enumerate(params):
        h = jnp.dot(h, w.T, precision=_PREC) + b
        if i < len(params) - 1:
            h = jnp.maximum(h, 0.0)
    return h


@functools.partial(jax.jit,
                   static_argnames=("bt", "min_pallas_batch", "transpose_output"))
def hvac_forward(x, params, *, bt=2048, min_pallas_batch=1024,
                 transpose_output=True):
    """x: (B, 3) float32.  params: PyTorch-layout [(W(out,in), b(out,))] * 4.

    Returns (B, 3) (module semantics).  transpose_output=False returns the
    feature-major (3, B) result, skipping the final transpose pass.
    """
    B = x.shape[0]
    x = x.astype(jnp.float32)

    # Small-batch fast path: pallas_call launch cost dominates there and XLA
    # fuses a 3->32->64->32->3 MLP fine.
    if B < min_pallas_batch:
        out = _xla_mlp(x, params)
        return out if transpose_output else out.T

    B_pad = _round_up(B, LANE)
    bt_eff = _pick_batch_tile(B_pad, bt)
    chunk = _pick_chunk(bt_eff)
    n_steps = B_pad // bt_eff

    # At most 127 zero rows of padding (bt_eff divides round_up(B, 128)).
    x_in = x if B_pad == B else jnp.zeros((B_pad, 3), jnp.float32).at[:B, :].set(x)

    staged = _stage_params(params)

    # Weights/biases: full-array blocks with constant index_maps -> VMEM
    # resident across the whole grid, never re-DMA'd.
    const_spec = lambda a: pl.BlockSpec(a.shape, lambda i: (0, 0))

    kernel = functools.partial(_mlp_kernel, chunk=chunk, n_chunks=bt_eff // chunk)

    out = pl.pallas_call(
        kernel,
        out_shape=jax.ShapeDtypeStruct((3, B_pad), jnp.float32),
        grid=(n_steps,),
        in_specs=[pl.BlockSpec((bt_eff, 3), lambda i: (i, 0))]
                 + [const_spec(a) for a in staged],
        out_specs=pl.BlockSpec((3, bt_eff), lambda i: (0, i)),
        compiler_params=pltpu.CompilerParams(
            dimension_semantics=_batch_axis_semantics(n_steps)),
    )(x_in, *staged)

    out = out[:, :B]
    return out.T if transpose_output else out


def init_params(key):
    """PyTorch nn.Linear default init: U[-1/sqrt(fan_in), +1/sqrt(fan_in)].

    Stored in PyTorch layout: W (out_features, in_features), b (out_features,).
    """
    dims = [(3, 32), (32, 64), (64, 32), (32, 3)]
    params = []
    for fan_in, fan_out in dims:
        key, kw, kb = jax.random.split(key, 3)
        bound = fan_in ** -0.5
        w = jax.random.uniform(kw, (fan_out, fan_in), jnp.float32, -bound, bound)
        b = jax.random.uniform(kb, (fan_out,), jnp.float32, -bound, bound)
        params.append((w, b))
    return params


if __name__ == "__main__":
    key = jax.random.PRNGKey(0)
    key, k1, k2, k3 = jax.random.split(key, 4)
    params = init_params(key)

    cases = [
        (8,    k1, dict(min_pallas_batch=0)),   # small batch, forced through the Pallas kernel
        (300,  k2, dict(min_pallas_batch=0)),   # non-multiple of 128: pad + slice path, grid=3
        (4096, k3, dict()),                     # default path: 2 grid steps x 2048-wide tiles
    ]
    for B, kk, kwargs in cases:
        x = jax.random.normal(kk, (B, 3), jnp.float32)
        out = jax.block_until_ready(hvac_forward(x, params, **kwargs))
        ref = _xla_mlp(x, params)
        assert out.shape == (B, 3), (B, out.shape)
        assert jnp.allclose(out, ref, atol=1e-5, rtol=1e-5), f"mismatch at B={B}"

    print("KERNEL_OK")
</pallas_src>

<mosaic_0001>
module attributes {stable_mosaic.version = 11 : i64} {
  func.func @_mlp_kernel(%arg0: i32, %arg1: memref<128x3xf32, #tpu.memory_space<vmem>>, %arg2: memref<32x3xf32, #tpu.memory_space<vmem>>, %arg3: memref<32x1xf32, #tpu.memory_space<vmem>>, %arg4: memref<64x32xf32, #tpu.memory_space<vmem>>, %arg5: memref<64x1xf32, #tpu.memory_space<vmem>>, %arg6: memref<32x64xf32, #tpu.memory_space<vmem>>, %arg7: memref<32x1xf32, #tpu.memory_space<vmem>>, %arg8: memref<3x32xf32, #tpu.memory_space<vmem>>, %arg9: memref<3x1xf32, #tpu.memory_space<vmem>>, %arg10: memref<3x128xf32, #tpu.memory_space<vmem>>) attributes {dimension_semantics = [#tpu.dimension_semantics<parallel>], iteration_bounds = array<i64: 1>, scalar_prefetch = 0 : i64, scratch_operands = 0 : i64, tpu.core_type = #tpu.core_type<tc>, window_params = [{transform_indices = @transform_0, window_bounds = array<i64: 128, 3>}, {pipeline_mode = #tpu.pipeline_mode<synchronous>, transform_indices = @transform_1, window_bounds = array<i64: 32, 3>}, {pipeline_mode = #tpu.pipeline_mode<synchronous>, transform_indices = @transform_2, window_bounds = array<i64: 32, 1>}, {pipeline_mode = #tpu.pipeline_mode<synchronous>, transform_indices = @transform_3, window_bounds = array<i64: 64, 32>}, {pipeline_mode = #tpu.pipeline_mode<synchronous>, transform_indices = @transform_4, window_bounds = array<i64: 64, 1>}, {pipeline_mode = #tpu.pipeline_mode<synchronous>, transform_indices = @transform_5, window_bounds = array<i64: 32, 64>}, {pipeline_mode = #tpu.pipeline_mode<synchronous>, transform_indices = @transform_6, window_bounds = array<i64: 32, 1>}, {pipeline_mode = #tpu.pipeline_mode<synchronous>, transform_indices = @transform_7, window_bounds = array<i64: 3, 32>}, {pipeline_mode = #tpu.pipeline_mode<synchronous>, transform_indices = @transform_8, window_bounds = array<i64: 3, 1>}, {transform_indices = @transform_9, window_bounds = array<i64: 3, 128>}]} {
    %c0_i32 = arith.constant 0 : i32
    %c128_i32 = arith.constant 128 : i32
    %0 = arith.muli %c0_i32, %c128_i32 : i32
    %1 = tpu.assume_multiple %0, 128 : i32
    %2 = arith.index_cast %1 : i32 to index
    %c0 = arith.constant 0 : index
    %3 = vector.load %arg1[%2, %c0] : memref<128x3xf32, #tpu.memory_space<vmem>>, vector<128x3xf32>
    %c0_0 = arith.constant 0 : index
    %c0_1 = arith.constant 0 : index
    %4 = vector.load %arg2[%c0_0, %c0_1] : memref<32x3xf32, #tpu.memory_space<vmem>>, vector<32x3xf32>
    %cst = arith.constant dense<0.000000e+00> : vector<32x128xf32>
    %5 = tpu.matmul %4, %3, %cst {dimension_numbers = #tpu.dot_dimension_numbers<[1], [1], [0], [0], [0, 0, 1, 0], [], []>, precision = #tpu.contract_precision<fp32>} : vector<32x3xf32>, vector<128x3xf32>, vector<32x128xf32> -> vector<32x128xf32>
    %c0_2 = arith.constant 0 : index
    %c0_3 = arith.constant 0 : index
    %6 = vector.load %arg3[%c0_2, %c0_3] : memref<32x1xf32, #tpu.memory_space<vmem>>, vector<32x1xf32>
    %7 = vector.broadcast %6 : vector<32x1xf32> to vector<32x128xf32>
    %8 = arith.addf %5, %7 : vector<32x128xf32>
    %cst_4 = arith.constant 0.000000e+00 : f32
    %9 = vector.broadcast %cst_4 : f32 to vector<32x128xf32>
    %10 = arith.maximumf %8, %9 : vector<32x128xf32>
    %c0_5 = arith.constant 0 : index
    %c0_6 = arith.constant 0 : index
    %11 = vector.load %arg4[%c0_5, %c0_6] : memref<64x32xf32, #tpu.memory_space<vmem>>, vector<64x32xf32>
    %cst_7 = arith.constant dense<0.000000e+00> : vector<64x128xf32>
    %12 = tpu.matmul %11, %10, %cst_7 {dimension_numbers = #tpu.dot_dimension_numbers<[1], [0], [0], [1], [0, 0, 1, 1], [], []>, precision = #tpu.contract_precision<fp32>} : vector<64x32xf32>, vector<32x128xf32>, vector<64x128xf32> -> vector<64x128xf32>
    %c0_8 = arith.constant 0 : index
    %c0_9 = arith.constant 0 : index
    %13 = vector.load %arg5[%c0_8, %c0_9] : memref<64x1xf32, #tpu.memory_space<vmem>>, vector<64x1xf32>
    %14 = vector.broadcast %13 : vector<64x1xf32> to vector<64x128xf32>
    %15 = arith.addf %12, %14 : vector<64x128xf32>
    %cst_10 = arith.constant 0.000000e+00 : f32
    %16 = vector.broadcast %cst_10 : f32 to vector<64x128xf32>
    %17 = arith.maximumf %15, %16 : vector<64x128xf32>
    %c0_11 = arith.constant 0 : index
    %c0_12 = arith.constant 0 : index
    %18 = vector.load %arg6[%c0_11, %c0_12] : memref<32x64xf32, #tpu.memory_space<vmem>>, vector<32x64xf32>
    %cst_13 = arith.constant dense<0.000000e+00> : vector<32x128xf32>
    %19 = tpu.matmul %18, %17, %cst_13 {dimension_numbers = #tpu.dot_dimension_numbers<[1], [0], [0], [1], [0, 0, 1, 1], [], []>, precision = #tpu.contract_precision<fp32>} : vector<32x64xf32>, vector<64x128xf32>, vector<32x128xf32> -> vector<32x128xf32>
    %c0_14 = arith.constant 0 : index
    %c0_15 = arith.constant 0 : index
    %20 = vector.load %arg7[%c0_14, %c0_15] : memref<32x1xf32, #tpu.memory_space<vmem>>, vector<32x1xf32>
    %21 = vector.broadcast %20 : vector<32x1xf32> to vector<32x128xf32>
    %22 = arith.addf %19, %21 : vector<32x128xf32>
    %cst_16 = arith.constant 0.000000e+00 : f32
    %23 = vector.broadcast %cst_16 : f32 to vector<32x128xf32>
    %24 = arith.maximumf %22, %23 : vector<32x128xf32>
    %c0_17 = arith.constant 0 : index
    %c0_18 = arith.constant 0 : index
    %25 = vector.load %arg8[%c0_17, %c0_18] : memref<3x32xf32, #tpu.memory_space<vmem>>, vector<3x32xf32>
    %cst_19 = arith.constant dense<0.000000e+00> : vector<3x128xf32>
    %26 = tpu.matmul %25, %24, %cst_19 {dimension_numbers = #tpu.dot_dimension_numbers<[1], [0], [0], [1], [0, 0, 1, 1], [], []>, precision = #tpu.contract_precision<fp32>} : vector<3x32xf32>, vector<32x128xf32>, vector<3x128xf32> -> vector<3x128xf32>
    %c0_20 = arith.constant 0 : index
    %c0_21 = arith.constant 0 : index
    %27 = vector.load %arg9[%c0_20, %c0_21] : memref<3x1xf32, #tpu.memory_space<vmem>>, vector<3x1xf32>
    %28 = vector.broadcast %27 : vector<3x1xf32> to vector<3x128xf32>
    %29 = arith.addf %26, %28 : vector<3x128xf32>
    %c0_22 = arith.constant 0 : index
    %30 = arith.index_cast %1 : i32 to index
    %31 = vector.load %arg10[%c0_22, %30] : memref<3x128xf32, #tpu.memory_space<vmem>>, vector<3x128xf32>
    tpu.vector_store %arg10[%c0_22, %30], %29 {strides = array<i32>} : memref<3x128xf32, #tpu.memory_space<vmem>>, vector<3x128xf32>,
    %c1_i32 = arith.constant 1 : i32
    return
  }
  func.func @transform_0(%arg0: i32) -> (i32, i32) {
    %c0_i32 = arith.constant 0 : i32
    %c0_i32_0 = arith.constant 0 : i32
    return %arg0, %c0_i32 : i32, i32
  }
  func.func @transform_1(%arg0: i32) -> (i32, i32) {
    %c0_i32 = arith.constant 0 : i32
    %c0_i32_0 = arith.constant 0 : i32
    %c0_i32_1 = arith.constant 0 : i32
    return %c0_i32, %c0_i32_0 : i32, i32
  }
  func.func @transform_2(%arg0: i32) -> (i32, i32) {
    %c0_i32 = arith.constant 0 : i32
    %c0_i32_0 = arith.constant 0 : i32
    %c0_i32_1 = arith.constant 0 : i32
    return %c0_i32, %c0_i32_0 : i32, i32
  }
  func.func @transform_3(%arg0: i32) -> (i32, i32) {
    %c0_i32 = arith.constant 0 : i32
    %c0_i32_0 = arith.constant 0 : i32
    %c0_i32_1 = arith.constant 0 : i32
    return %c0_i32, %c0_i32_0 : i32, i32
  }
  func.func @transform_4(%arg0: i32) -> (i32, i32) {
    %c0_i32 = arith.constant 0 : i32
    %c0_i32_0 = arith.constant 0 : i32
    %c0_i32_1 = arith.constant 0 : i32
    return %c0_i32, %c0_i32_0 : i32, i32
  }
  func.func @transform_5(%arg0: i32) -> (i32, i32) {
    %c0_i32 = arith.constant 0 : i32
    %c0_i32_0 = arith.constant 0 : i32
    %c0_i32_1 = arith.constant 0 : i32
    return %c0_i32, %c0_i32_0 : i32, i32
  }
  func.func @transform_6(%arg0: i32) -> (i32, i32) {
    %c0_i32 = arith.constant 0 : i32
    %c0_i32_0 = arith.constant 0 : i32
    %c0_i32_1 = arith.constant 0 : i32
    return %c0_i32, %c0_i32_0 : i32, i32
  }
  func.func @transform_7(%arg0: i32) -> (i32, i32) {
    %c0_i32 = arith.constant 0 : i32
    %c0_i32_0 = arith.constant 0 : i32
    %c0_i32_1 = arith.constant 0 : i32
    return %c0_i32, %c0_i32_0 : i32, i32
  }
  func.func @transform_8(%arg0: i32) -> (i32, i32) {
    %c0_i32 = arith.constant 0 : i32
    %c0_i32_0 = arith.constant 0 : i32
    %c0_i32_1 = arith.constant 0 : i32
    return %c0_i32, %c0_i32_0 : i32, i32
  }
  func.func @transform_9(%arg0: i32) -> (i32, i32) {
    %c0_i32 = arith.constant 0 : i32
    %c0_i32_0 = arith.constant 0 : i32
    return %c0_i32, %arg0 : i32, i32
  }
}

</mosaic_0001>

<bundles_post_ra>
// kernel: hvac_forward.1
= control target key start
LH: loop header
LB: loop body
LE: loop exit
PB: predicated region body
PF: predicated region fallthrough
CT: control target
= control target key end

     0   :  { %vm76_vm0 = vcmask 23552   ;;  %vm967_vm1 = vcmask 261120   ;;  %vm1814_vm2 = vcmask 523264   ;;  %vm3844_vm3 = vmmov 0   ;;  %s4973_s0 = inlined_call_operand.vmem [shape: f32[128,3], index: 0, kind: input, shape index: {}]   ;;  %s4974_s1 = inlined_call_operand.vmem [shape: f32[32,3], index: 1, kind: input, shape index: {}]   ;;  %s4975_s2 = inlined_call_operand.vmem [shape: f32[32,1], index: 2, kind: input, shape index: {}]   ;;  %s4976_s4 = inlined_call_operand.vmem [shape: f32[64,1], index: 4, kind: input, shape index: {}]   ;;  %s4977_s6 = inlined_call_operand.vmem [shape: f32[32,1], index: 6, kind: input, shape index: {}]   ;;  %s4978_s8 = inlined_call_operand.vmem [shape: f32[3,1], index: 8, kind: input, shape index: {}]   ;;  %s4979_s3 = inlined_call_operand.vmem [shape: f32[64,32], index: 3, kind: input, shape index: {}]   ;;  %s4980_s5 = inlined_call_operand.vmem [shape: f32[32,64], index: 5, kind: input, shape index: {}]   ;;  %s4981_s7 = inlined_call_operand.vmem [shape: f32[3,32], index: 7, kind: input, shape index: {}]   ;;  %s4982_s9 = inlined_call_operand.vmem [shape: f32[3,128], index: 9, kind: output, shape index: {}]  }
   0x1   :  { %v47_v0 = vld [vmem:[%s4973_s0 + $0x78] sm:$0xff]  ;;  %v46_v1 = vld [vmem:[%s4973_s0 + $0x70] sm:$0xff]  ;;  %v45_v2 = vld [vmem:[%s4973_s0 + $0x68] sm:$0xff] }
   0x2   :  { %v135_v3 = vsel %vm76_vm0, %v47_v0, 0  ;;  %v132_v4 = vsel %vm76_vm0, %v46_v1, 0  ;;  %v129_v5 = vsel %vm76_vm0, %v45_v2, 0  ;;  %v44_v6 = vld [vmem:[%s4973_s0 + $0x60] sm:$0xff]  ;;  %v43_v7 = vld [vmem:[%s4973_s0 + $0x58] sm:$0xff]  ;;  %v42_v12 = vld [vmem:[%s4973_s0 + $0x50] sm:$0xff] }
   0x3   :  { %v3913_v8 = vand.u32 4294901760, %v135_v3  ;;  %v3915_v9 = vand.u32 4294901760, %v132_v4  ;;  %v3917_v10 = vand.u32 4294901760, %v129_v5  ;;  %v126_v11 = vsel %vm76_vm0, %v44_v6, 0  ;;  %v41_v24 = vld [vmem:[%s4973_s0 + $0x48] sm:$0xff]  ;;  %v40_v34 = vld [vmem:[%s4973_s0 + $0x40] sm:$0xff] }
   0x4   :  { %v3923_v13 = vand.u32 4294901760, %v126_v11  ;;  %v123_v14 = vsel %vm76_vm0, %v43_v7, 0  ;;  %v120_v19 = vsel %vm76_vm0, %v42_v12, 0  ;;  %v117_v28 = vsel %vm76_vm0, %v41_v24, 0  ;;  %v39_v41 = vld [vmem:[%s4973_s0 + $0x38] sm:$0xff]  ;;  %v48_v48 = vld [vmem:[%s4974_s1] sm:$0xff] }
   0x5   :  { %3291 = vmatprep.subr.mxu0 %v3913_v8  ;;  %v3928_v15 = vsub.f32 %v135_v3, %v3913_v8  ;;  %v3931_v16 = vsub.f32 %v132_v4, %v3915_v9  ;;  %v3934_v17 = vsub.f32 %v129_v5, %v3917_v10  ;;  %v3937_v18 = vand.u32 4294901760, %v123_v14  ;;  %v38_v49 = vld [vmem:[%s4973_s0 + $0x30] sm:$0xff]  ;;  %v37_v57 = vld [vmem:[%s4973_s0 + $0x28] sm:$0xff]  ;;  %v36_v2 = vld [vmem:[%s4973_s0 + $0x20] sm:$0xff] }
   0x6   :  { %3292 = vmatpush3.xpose.msra.mxu0 %v3913_v8  ;;  %v3951_v23 = vsub.f32 %v126_v11, %v3923_v13  ;;  %v3961_v27 = vand.u32 4294901760, %v120_v19  ;;  %v3977_v35 = vand.u32 4294901760, %v117_v28  ;;  %v114_v40 = vsel %vm76_vm0, %v40_v34, 0  ;;  %v53_v11 = vld [vmem:[%s4975_s2 + $0x8] sm:$0xff]  ;;  %v35_v24 = vld [vmem:[%s4973_s0 + $0x18] sm:$0xff] }
   0x7   :  { %3293 = vmatprep.subr.mxu0 %v3915_v9  ;;  %v3942_v20 = vand.u32 4294901760, %v3928_v15  ;;  %v3945_v21 = vand.u32 4294901760, %v3931_v16  ;;  %v3948_v22 = vand.u32 4294901760, %v3934_v17  ;;  %v3965_v29 = vsub.f32 %v123_v14, %v3937_v18 }
   0x8   :  { %v3971_v33 = vand.u32 4294901760, %v3951_v23  ;;  %v3980_v36 = vsub.f32 %v120_v19, %v3961_v27  ;;  %v3997_v43 = vsub.f32 %v117_v28, %v3977_v35  ;;  %v4002_v46 = vand.u32 4294901760, %v114_v40 }
   0x9   :  { %v262_v25 = vsub.f32 %v3928_v15, %v3942_v20  ;;  %v269_v26 = vsub.f32 %v3931_v16, %v3945_v21  ;;  %v276_v32 = vsub.f32 %v3934_v17, %v3948_v22  ;;  %v3986_v39 = vand.u32 4294901760, %v3965_v29 }
   0xa   :  { %3294 = vmatpush3.xpose.msra.mxu0 %v3915_v9  ;;  %v283_v38 = vsub.f32 %v3951_v23, %v3971_v33  ;;  %v3994_v42 = vand.u32 4294901760, %v3980_v36  ;;  %v111_v47 = vsel %vm76_vm0, %v39_v41, 0  ;;  %v4017_v52 = vand.u32 4294901760, %v3997_v43 }
   0xb   :  { %3295 = vmatprep.subr.mxu0 %v3917_v10  ;;  %v263_v30 = vand.u32 4294901760, %v262_v25  ;;  %v270_v31 = vand.u32 4294901760, %v269_v26  ;;  %v277_v37 = vand.u32 4294901760, %v276_v32  ;;  %v290_v45 = vsub.f32 %v3965_v29, %v3986_v39 }
   0xc   :  { %v284_v44 = vand.u32 4294901760, %v283_v38  ;;  %v297_v50 = vsub.f32 %v3980_v36, %v3994_v42  ;;  %v4014_v51 = vand.u32 4294901760, %v111_v47  ;;  %v78_v53 = vsel %vm76_vm0, %v48_v48, 0 }
   0xd   :  { %3329 = vmatprep.subr.mxu1 %v263_v30  ;;  %v291_v54 = vand.u32 4294901760, %v290_v45  ;;  %v108_v55 = vsel %vm76_vm0, %v38_v49, 0  ;;  %v4023_v56 = vsub.f32 %v114_v40, %v4002_v46  ;;  %v4028_v58 = vand.u32 4294901760, %v78_v53  ;;  %v34_v40 = vld [vmem:[%s4973_s0 + $0x10] sm:$0xff] }
   0xe   :  { %3296 = vmatpush3.xpose.msra.mxu0 %v3917_v10  ;;  %3330 = vmatpush3.xpose.msra.mxu1 %v263_v30  ;;  %v298_v60 = vand.u32 4294901760, %v297_v50  ;;  %v4035_v61 = vand.u32 4294901760, %v108_v55  ;;  %v105_v62 = vsel %vm76_vm0, %v37_v57, 0  ;;  %v304_v63 = vsub.f32 %v3997_v43, %v4017_v52  ;;  %v33_v50 = vld [vmem:[%s4973_s0 + $0x8] sm:$0xff] }
   0xf   :  { %3297 = vmatprep.subr.mxu0 %v3923_v13  ;;  %3331 = vmatprep.subr.mxu1 %v270_v31  ;;  %v4031_v59 = vsub.f32 %v78_v53, %v4028_v58  ;;  %v4042_v0 = vand.u32 4294901760, %v4023_v56  ;;  %v4045_v1 = vsub.f32 %v111_v47, %v4014_v51  ;;  %v4055_v5 = vand.u32 4294901760, %v105_v62 }
  0x10   :  { %3361 = vmatprep.mubr.f32.mxu1 %v4028_v58  ;;  %v102_v6 = vsel %vm76_vm0, %v36_v2, 0  ;;  %v4059_v7 = vsub.f32 %v108_v55, %v4035_v61  ;;  %v305_v12 = vand.u32 4294901760, %v304_v63  ;;  %v3842_v26 = vmov 0   ;;  %v32_v63 = vld [vmem:[%s4973_s0] sm:$0xff]  ;;  %v49_v2 = vld [vmem:[%s4974_s1 + $0x8] sm:$0xff] }
  0x11   :  { %v4983_v3 = vand.u32 4294901760, %v4031_v59  ;;  %v311_v14 = vsub.f32 %v4023_v56, %v4042_v0  ;;  %v4068_v19 = vand.u32 4294901760, %v4045_v1  ;;  %3841 = vset.pattern.permute.xlu1 %v3842_v26  ;;  %3840 = vset.pattern.permute.xlu0 %v3842_v26  ;;  %v4074_v28 = vand.u32 4294901760, %v102_v6 }
  0x12   :  { %3298 = vmatpush3.xpose.msra.mxu0 %v3923_v13  ;;  %3332 = vmatpush3.xpose.msra.mxu1 %v270_v31  ;;  %v99_v30 = vsel %vm76_vm0, %v35_v24, 0  ;;  %v52_v31 = vld [vmem:[%s4975_s2] sm:$0xff]  ;;  %v4087_v38 = vsub.f32 %v105_v62, %v4055_v5 }
  0x13   :  { %3299 = vmatprep.subr.mxu0 %v3937_v18  ;;  %3333 = vmatprep.subr.mxu1 %v277_v37  ;;  %v221_v4 = vsub.f32 %v4031_v59, %v4983_v3  ;;  %v312_v32 = vand.u32 4294901760, %v311_v14  ;;  %v318_v34 = vsub.f32 %v4045_v1, %v4068_v19  ;;  %v4093_v41 = vand.u32 4294901760, %v99_v30 }
  0x14   :  { %63 = vperm.xlu1 %3841, %v53_v11   ;;  %v4100_v48 = vand.u32 4294901760, %v4087_v38  ;;  %v4103_v49 = vsub.f32 %v102_v6, %v4074_v28  ;;  %v90_v6 = vsel %vm76_vm0, %v32_v63, 0  ;;  %v81_v11 = vsel %vm76_vm0, %v49_v2, 0 }
  0x15   :  { %v222_v25 = vand.u32 4294901760, %v221_v4  ;;  %v319_v45 = vand.u32 4294901760, %v318_v34  ;;  %v4119_v62 = vsub.f32 %v99_v30, %v4093_v41  ;;  %v51_v30 = vld [vmem:[%s4974_s1 + $0x18] sm:$0xff]  ;;  %v4151_v34 = vand.u32 4294901760, %v90_v6 }
  0x16   :  { %3300 = vmatpush3.xpose.msra.mxu0 %v3937_v18  ;;  %3334 = vmatpush3.xpose.msra.mxu1 %v277_v37  ;;  %v4084_v37 = vand.u32 4294901760, %v4059_v7  ;;  %v332_v57 = vsub.f32 %v4087_v38, %v4100_v48 }
  0x17   :  { %3301 = vmatprep.subr.mxu0 %v3961_v27  ;;  %3335 = vmatprep.subr.mxu1 %v284_v44 }
  0x18   :  { %3323 = vmatprep.mubr.f32.mxu0 %v222_v25  ;;  %58 = vperm.xlu1 %3841, %v52_v31   ;;  %v325_v47 = vsub.f32 %v4059_v7, %v4084_v37  ;;  %v333_v14 = vand.u32 4294901760, %v332_v57  ;;  %v4139_v25 = vand.u32 4294901760, %v4119_v62  ;;  %v4147_v31 = vand.u32 4294901760, %v81_v11 }
  0x1a   :  { %3302 = vmatpush3.xpose.msra.mxu0 %v3961_v27  ;;  %3336 = vmatpush3.xpose.msra.mxu1 %v284_v44  ;;  %v96_v44 = vsel %vm76_vm0, %v34_v40, 0  ;;  %v326_v55 = vand.u32 4294901760, %v325_v47  ;;  %5000 = vst [vmem:[#allocation3_spill] sm:$0xff] %v4139_v25  ;;  %v87_v40 = vsel %vm76_vm0, %v51_v30, 0 }
  0x1b   :  { %3303 = vmatprep.subr.mxu0 %v3977_v35  ;;  %3337 = vmatprep.subr.mxu1 %v291_v54  ;;  %v4109_v53 = vand.u32 4294901760, %v96_v44  ;;  %v4168_v63 = vand.u32 4294901760, %v87_v40 }
  0x1d   :  { %v4142_v26 = vsub.f32 %v96_v44, %v4109_v53 }
  0x1e   :  { %3304 = vmatpush3.xpose.msra.mxu0 %v3977_v35  ;;  %3338 = vmatpush3.xpose.msra.mxu1 %v291_v54  ;;  %v93_v54 = vsel %vm76_vm0, %v33_v50, 0 }
  0x1f   :  { %3305 = vmatprep.subr.mxu0 %v4002_v46  ;;  %3339 = vmatprep.subr.mxu1 %v298_v60  ;;  %v4128_v4 = vand.u32 4294901760, %v93_v54  ;;  %v4158_v47 = vand.u32 4294901760, %v4142_v26 }
  0x21   :  { %5001 = vst [vmem:[#allocation4_spill] sm:$0xff] %v4158_v47  ;;  %v4161_v50 = vsub.f32 %v93_v54, %v4128_v4 }
  0x22   :  { %3306 = vmatpush3.xpose.msra.mxu0 %v4002_v46  ;;  %3340 = vmatpush3.xpose.msra.mxu1 %v298_v60  ;;  %v4116_v60 = vand.u32 4294901760, %v4103_v49 }
  0x23   :  { %3307 = vmatprep.subr.mxu0 %v4014_v51  ;;  %3341 = vmatprep.subr.mxu1 %v305_v12  ;;  %v4175_v54 = vand.u32 4294901760, %v4161_v50 }
  0x24   :  { %4999 = vst [vmem:[#allocation2_spill] sm:$0xff] %v4116_v60  ;;  %v339_v24 = vsub.f32 %v4103_v49, %v4116_v60 }
  0x25   :  { %5002 = vst [vmem:[#allocation5_spill] sm:$0xff] %v4175_v54  ;;  %v360_v3 = vsub.f32 %v4161_v50, %v4175_v54 }
  0x26   :  { %3308 = vmatpush3.xpose.msra.mxu0 %v4014_v51  ;;  %3342 = vmatpush3.xpose.msra.mxu1 %v305_v12  ;;  %v50_v12 = vld [vmem:[%s4974_s1 + $0x10] sm:$0xff]  ;;  %v340_v44 = vand.u32 4294901760, %v339_v24  ;;  %v4178_v24 = vsub.f32 %v90_v6, %v4151_v34 }
  0x27   :  { %3309 = vmatprep.subr.mxu0 %v4035_v61  ;;  %3343 = vmatprep.subr.mxu1 %v312_v32 }
  0x28   :  { %v4192_v6 = vand.u32 4294901760, %v4178_v24 }
  0x2a   :  { %3310 = vmatpush3.xpose.msra.mxu0 %v4035_v61  ;;  %3344 = vmatpush3.xpose.msra.mxu1 %v312_v32  ;;  %v84_v32 = vsel %vm76_vm0, %v50_v12, 0  ;;  %v353_v12 = vsub.f32 %v4142_v26, %v4158_v47 }
  0x2b   :  { %3311 = vmatprep.subr.mxu0 %v4055_v5  ;;  %3345 = vmatprep.subr.mxu1 %v319_v45  ;;  %v4163_v57 = vand.u32 4294901760, %v84_v32 }
  0x2e   :  { %3312 = vmatpush3.xpose.msra.mxu0 %v4055_v5  ;;  %3346 = vmatpush3.xpose.msra.mxu1 %v319_v45  ;;  %v346_v45 = vsub.f32 %v4119_v62, %v4139_v25 }
  0x2f   :  { %3313 = vmatprep.subr.mxu0 %v4074_v28  ;;  %3347 = vmatprep.subr.mxu1 %v326_v55 }
  0x30   :  { %v347_v2 = vand.u32 4294901760, %v346_v45  ;;  %v354_v45 = vand.u32 4294901760, %v353_v12  ;;  %v367_v12 = vsub.f32 %v4178_v24, %v4192_v6 }
  0x32   :  { %3314 = vmatpush3.xpose.msra.mxu0 %v4074_v28  ;;  %3348 = vmatpush3.xpose.msra.mxu1 %v326_v55  ;;  %v4166_v55 = vsub.f32 %v81_v11, %v4147_v31  ;;  %v4181_v11 = vsub.f32 %v84_v32, %v4163_v57 }
  0x33   :  { %3315 = vmatprep.subr.mxu0 %v4093_v41  ;;  %3349 = vmatprep.subr.mxu1 %v333_v14 }
  0x34   :  { %v4990_v30 = vand.u32 4294901760, %v4166_v55  ;;  %v240_v32 = vand.u32 4294901760, %v4181_v11 }
  0x36   :  { %3316 = vmatpush3.xpose.msra.mxu0 %v4093_v41  ;;  %3350 = vmatpush3.xpose.msra.mxu1 %v333_v14  ;;  %v4185_v14 = vsub.f32 %v87_v40, %v4168_v63  ;;  %v231_v40 = vsub.f32 %v4166_v55, %v4990_v30  ;;  %v241_v54 = vsub.f32 %v4181_v11, %v240_v32 }
  0x37   :  { %3317 = vmatprep.subr.mxu0 %v4109_v53  ;;  %3351 = vmatprep.subr.mxu1 %v340_v44 }
  0x38   :  { %v250_v47 = vand.u32 4294901760, %v4185_v14  ;;  %v232_v25 = vand.u32 4294901760, %v231_v40  ;;  %v55_v40 = vld [vmem:[%s4975_s2 + $0x18] sm:$0xff] }
  0x39   :  { %73 = vperm.xlu0 %3840, %v55_v40  }
  0x3a   :  { %3318 = vmatpush3.xpose.msra.mxu0 %v4109_v53  ;;  %3352 = vmatpush3.xpose.msra.mxu1 %v340_v44  ;;  %v361_v44 = vand.u32 4294901760, %v360_v3  ;;  %v251_v30 = vsub.f32 %v4185_v14, %v250_v47  ;;  %v242_v3 = vand.u32 4294901760, %v241_v54  ;;  %v920_v54 = vld [vmem:[%s4976_s4 + $0x8] sm:$0xff] }
  0x3b   :  { %3319 = vmatprep.subr.mxu0 %v4128_v4  ;;  %3353 = vmatprep.subr.mxu1 %v347_v2 }
  0x3c   :  { %v252_v60 = vand.u32 4294901760, %v251_v30  ;;  %v1793_v30 = vld [vmem:[%s4977_s6 + $0x18] sm:$0xff] }
  0x3e   :  { %3320 = vmatpush3.xpose.msra.mxu0 %v4128_v4  ;;  %3354 = vmatpush3.xpose.msra.mxu1 %v347_v2  ;;  %v368_v2 = vand.u32 4294901760, %v367_v12 }
  0x3f   :  { %3321 = vmatprep.subr.mxu0 %v4151_v34  ;;  %3355 = vmatprep.subr.mxu1 %v354_v45 }
  0x42   :  { %3322 = vmatpush3.xpose.msra.mxu0 %v4151_v34  ;;  %3356 = vmatpush3.xpose.msra.mxu1 %v354_v45  ;;  %v1791_v45 = vld [vmem:[%s4977_s6 + $0x8] sm:$0xff] }
  0x43   :  { %3357 = vmatprep.subr.mxu1 %v361_v44  ;;  %3367 = vmatprep.subr.mxu0 %v3928_v15 }
  0x45   :  { %3324 = vmatmul.mubr.f32.vlgmr.msra.gmra.mxu0 %v232_v25  ;;  %v54_v25 = vld [vmem:[%s4975_s2 + $0x10] sm:$0xff] }
  0x46   :  { %3358 = vmatpush3.xpose.msra.mxu1 %v361_v44  ;;  %3368 = vmatpush3.xpose.msra.mxu0 %v3928_v15  ;;  %v926_v15 = vld [vmem:[%s4976_s4 + $0x38] sm:$0xff] }
  0x47   :  { %3359 = vmatprep.subr.mxu1 %v368_v2  ;;  %3369 = vmatprep.subr.mxu0 %v3931_v16 }
  0x48   :  { %3326 = vmatprep.mubr.f32.mxu0 %v242_v3  ;;  %68 = vperm.xlu0 %3840, %v54_v25   ;;  %v914_v3 = vld [vmem:[%s4979_s3 + $0x18] sm:$0xff] }
  0x49   :  { %3327 = vmatmul.mubr.f32.gmra.mxu0 %v252_v60  ;;  %v923_v60 = vld [vmem:[%s4976_s4 + $0x20] sm:$0xff] }
  0x4a   :  { %3360 = vmatpush3.xpose.msra.mxu1 %v368_v2  ;;  %3370 = vmatpush3.xpose.msra.mxu0 %v3931_v16  ;;  %v925_v16 = vld [vmem:[%s4976_s4 + $0x30] sm:$0xff] }
  0x4b   :  { %3371 = vmatprep.subr.mxu0 %v3934_v17  ;;  %3405 = vmatprep.subr.mxu1 %v3913_v8 }
  0x4c   :  { %3399 = vmatprep.mubr.f32.mxu0 %v4031_v59  ;;  %964 = vperm.xlu0 %3840, %v926_v15  }
  0x4d   :  { %3362 = vmatmul.mubr.f32.vlgmr.msra.gmra.mxu1 %v4147_v31  ;;  %959 = vperm.xlu1 %3841, %v925_v16  }
  0x4e   :  { %3372 = vmatpush3.xpose.msra.mxu0 %v3934_v17  ;;  %3406 = vmatpush3.xpose.msra.mxu1 %v3913_v8  ;;  %v5003_v17 = vand.u32 4294901760, %v4031_v59  ;;  %v922_v59 = vld [vmem:[%s4976_s4 + $0x18] sm:$0xff] }
  0x4f   :  { %3373 = vmatprep.subr.mxu0 %v3951_v23  ;;  %3407 = vmatprep.subr.mxu1 %v3915_v9 }
  0x50   :  { %3364 = vmatprep.mubr.f32.mxu1 %v4163_v57 }
  0x51   :  { %3365 = vmatmul.mubr.f32.gmra.mxu1 %v4168_v63  ;;  %949 = vperm.xlu1 %3841, %v923_v60  }
  0x52   :  { %3374 = vmatpush3.xpose.msra.mxu0 %v3951_v23  ;;  %3408 = vmatpush3.xpose.msra.mxu1 %v3915_v9  ;;  %v924_v23 = vld [vmem:[%s4976_s4 + $0x28] sm:$0xff] }
  0x53   :  { %3375 = vmatprep.subr.mxu0 %v3965_v29  ;;  %3409 = vmatprep.subr.mxu1 %v3917_v10 }
  0x54   :  { %3437 = vmatprep.mubr.f32.mxu1 %v5003_v17  ;;  %954 = vperm.xlu0 %3840, %v924_v23  }
  0x56   :  { %3376 = vmatpush3.xpose.msra.mxu0 %v3965_v29  ;;  %3410 = vmatpush3.xpose.msra.mxu1 %v3917_v10  ;;  %v921_v29 = vld [vmem:[%s4976_s4 + $0x10] sm:$0xff] }
  0x57   :  { %3377 = vmatprep.subr.mxu0 %v3980_v36  ;;  %3411 = vmatprep.subr.mxu1 %v3923_v13 }
  0x58   :  { %944 = vperm.xlu0 %3840, %v922_v59   ;;  %939 = vperm.xlu1 %3841, %v921_v29   ;;  %v978_v29 = vsel %vm967_vm1, %v914_v3, 0 }
  0x5a   :  { %3378 = vmatpush3.xpose.msra.mxu0 %v3980_v36  ;;  %3412 = vmatpush3.xpose.msra.mxu1 %v3923_v13  ;;  %v919_v36 = vld [vmem:[%s4976_s4] sm:$0xff] }
  0x5b   :  { %3379 = vmatprep.subr.mxu0 %v3997_v43  ;;  %3413 = vmatprep.subr.mxu1 %v3937_v18 }
  0x5c   :  { %934 = vperm.xlu0 %3840, %v920_v54   ;;  %929 = vperm.xlu1 %3841, %v919_v36  }
  0x5e   :  { %3380 = vmatpush3.xpose.msra.mxu0 %v3997_v43  ;;  %3414 = vmatpush3.xpose.msra.mxu1 %v3937_v18  ;;  %v1792_v43 = vld [vmem:[%s4977_s6 + $0x10] sm:$0xff] }
  0x5f   :  { %3381 = vmatprep.subr.mxu0 %v4023_v56  ;;  %3415 = vmatprep.subr.mxu1 %v3961_v27 }
  0x60   :  { %1811 = vperm.xlu0 %3840, %v1793_v30   ;;  %1806 = vperm.xlu1 %3841, %v1792_v43  }
  0x62   :  { %3382 = vmatpush3.xpose.msra.mxu0 %v4023_v56  ;;  %3416 = vmatpush3.xpose.msra.mxu1 %v3961_v27  ;;  %v2498_v56 = vld [vmem:[%s4978_s8] sm:$0x7] }
  0x63   :  { %3383 = vmatprep.subr.mxu0 %v4045_v1  ;;  %3417 = vmatprep.subr.mxu1 %v3977_v35 }
  0x64   :  { %1801 = vperm.xlu0 %3840, %v1791_v45   ;;  %v915_v45 = vld [vmem:[%s4979_s3 + $0x20] sm:$0xff] }
  0x66   :  { %3384 = vmatpush3.xpose.msra.mxu0 %v4045_v1  ;;  %3418 = vmatpush3.xpose.msra.mxu1 %v3977_v35  ;;  %v1790_v1 = vld [vmem:[%s4977_s6] sm:$0xff] }
  0x67   :  { %3385 = vmatprep.subr.mxu0 %v4059_v7  ;;  %3419 = vmatprep.subr.mxu1 %v4002_v46 }
  0x68   :  { %2501 = vperm.xlu0 %3840, %v2498_v56   ;;  %1796 = vperm.xlu1 %3841, %v1790_v1  }
  0x6a   :  { %3386 = vmatpush3.xpose.msra.mxu0 %v4059_v7  ;;  %3420 = vmatpush3.xpose.msra.mxu1 %v4002_v46 }
  0x6b   :  { %3387 = vmatprep.subr.mxu0 %v4087_v38  ;;  %3421 = vmatprep.subr.mxu1 %v4014_v51 }
  0x6e   :  { %3388 = vmatpush3.xpose.msra.mxu0 %v4087_v38  ;;  %3422 = vmatpush3.xpose.msra.mxu1 %v4014_v51 }
  0x6f   :  { %3389 = vmatprep.subr.mxu0 %v4103_v49  ;;  %3423 = vmatprep.subr.mxu1 %v4035_v61 }
  0x72   :  { %3390 = vmatpush3.xpose.msra.mxu0 %v4103_v49  ;;  %3424 = vmatpush3.xpose.msra.mxu1 %v4035_v61 }
  0x73   :  { %3391 = vmatprep.subr.mxu0 %v4119_v62  ;;  %3425 = vmatprep.subr.mxu1 %v4055_v5 }
  0x76   :  { %3392 = vmatpush3.xpose.msra.mxu0 %v4119_v62  ;;  %3426 = vmatpush3.xpose.msra.mxu1 %v4055_v5 }
  0x77   :  { %3393 = vmatprep.subr.mxu0 %v4142_v26  ;;  %3427 = vmatprep.subr.mxu1 %v4074_v28 }
  0x7a   :  { %3394 = vmatpush3.xpose.msra.mxu0 %v4142_v26  ;;  %3428 = vmatpush3.xpose.msra.mxu1 %v4074_v28 }
  0x7b   :  { %3395 = vmatprep.subr.mxu0 %v4161_v50  ;;  %3429 = vmatprep.subr.mxu1 %v4093_v41 }
  0x7e   :  { %3396 = vmatpush3.xpose.msra.mxu0 %v4161_v50  ;;  %3430 = vmatpush3.xpose.msra.mxu1 %v4093_v41 }
  0x7f   :  { %3397 = vmatprep.subr.mxu0 %v4178_v24  ;;  %3431 = vmatprep.subr.mxu1 %v4109_v53 }
  0x82   :  { %3398 = vmatpush3.xpose.msra.mxu0 %v4178_v24  ;;  %3432 = vmatpush3.xpose.msra.mxu1 %v4109_v53 }
  0x83   :  { %3433 = vmatprep.subr.mxu1 %v4128_v4  ;;  %3443 = vmatprep.subr.mxu0 %v3942_v20 }
  0x85   :  { %3400 = vmatmul.mubr.f32.vlgmr.msra.gmra.mxu0 %v4166_v55 }
  0x86   :  { %3434 = vmatpush3.xpose.msra.mxu1 %v4128_v4  ;;  %3444 = vmatpush3.xpose.msra.mxu0 %v3942_v20  ;;  %v5004_v20 = vand.u32 4294901760, %v4166_v55 }
  0x87   :  { %3402 = vmatprep.mubr.f32.mxu0 %v4181_v11  ;;  %3435 = vmatprep.subr.mxu1 %v4151_v34 }
  0x88   :  { %3445 = vmatprep.subr.mxu0 %v3945_v21 }
  0x89   :  { %3403 = vmatmul.mubr.f32.gmra.mxu0 %v4185_v14 }
  0x8a   :  { %3436 = vmatpush3.xpose.msra.mxu1 %v4151_v34  ;;  %3446 = vmatpush3.xpose.msra.mxu0 %v3945_v21 }
  0x8b   :  { %3447 = vmatprep.subr.mxu0 %v3948_v22  ;;  %3481 = vmatprep.subr.mxu1 %v3913_v8 }
  0x8c   :  { %3475 = vmatprep.mubr.f32.mxu0 %v4028_v58 }
  0x8d   :  { %3438 = vmatmul.mubr.f32.vlgmr.msra.gmra.mxu1 %v5004_v20 }
  0x8e   :  { %3448 = vmatpush3.xpose.msra.mxu0 %v3948_v22  ;;  %3482 = vmatpush3.xpose.msra.mxu1 %v3913_v8  ;;  %v5005_v8 = vld [vmem:[#allocation2_spill] sm:$0xff] }
  0x8f   :  { %3440 = vmatprep.mubr.f32.mxu1 %v240_v32  ;;  %3449 = vmatprep.subr.mxu0 %v3971_v33  ;;  %v64_v7 = vpop.permute.xlu1 %63  ;;  %v913_v32 = vld [vmem:[%s4979_s3 + $0x10] sm:$0xff] }
  0x90   :  { %3483 = vmatprep.subr.mxu1 %v3915_v9  ;;  %v975_v60 = vsel %vm967_vm1, %v913_v32, 0 }
  0x91   :  { %3441 = vmatmul.mubr.f32.gmra.mxu1 %v250_v47  ;;  %v912_v47 = vld [vmem:[%s4979_s3 + $0x8] sm:$0xff] }
  0x92   :  { %3450 = vmatpush3.xpose.msra.mxu0 %v3971_v33  ;;  %3484 = vmatpush3.xpose.msra.mxu1 %v3915_v9  ;;  %v5006_v9 = vld [vmem:[#allocation3_spill] sm:$0xff] }
  0x93   :  { %3451 = vmatprep.subr.mxu0 %v3986_v39  ;;  %3485 = vmatprep.subr.mxu1 %v3917_v10 }
  0x94   :  { %3513 = vmatprep.mubr.f32.mxu1 %v4028_v58 }
  0x96   :  { %3452 = vmatpush3.xpose.msra.mxu0 %v3986_v39  ;;  %3486 = vmatpush3.xpose.msra.mxu1 %v3917_v10  ;;  %v5007_v10 = vld [vmem:[#allocation4_spill] sm:$0xff] }
  0x97   :  { %3453 = vmatprep.subr.mxu0 %v3994_v42  ;;  %3487 = vmatprep.subr.mxu1 %v3923_v13 }
  0x9a   :  { %3454 = vmatpush3.xpose.msra.mxu0 %v3994_v42  ;;  %3488 = vmatpush3.xpose.msra.mxu1 %v3923_v13  ;;  %v5008_v13 = vld [vmem:[#allocation5_spill] sm:$0xff] }
  0x9b   :  { %3455 = vmatprep.subr.mxu0 %v4017_v52  ;;  %3489 = vmatprep.subr.mxu1 %v3937_v18 }
  0x9e   :  { %3456 = vmatpush3.xpose.msra.mxu0 %v4017_v52  ;;  %3490 = vmatpush3.xpose.msra.mxu1 %v3937_v18  ;;  %v911_v18 = vld [vmem:[%s4979_s3] sm:$0xff] }
  0x9f   :  { %3457 = vmatprep.subr.mxu0 %v4042_v0  ;;  %3491 = vmatprep.subr.mxu1 %v3961_v27  ;;  %v969_v21 = vsel %vm967_vm1, %v911_v18, 0 }
  0xa0   :  { %v4410_v22 = vand.u32 4294901760, %v969_v21 }
  0xa2   :  { %3458 = vmatpush3.xpose.msra.mxu0 %v4042_v0  ;;  %3492 = vmatpush3.xpose.msra.mxu1 %v3961_v27  ;;  %v4413_v27 = vsub.f32 %v969_v21, %v4410_v22  ;;  %v916_v21 = vld [vmem:[%s4979_s3 + $0x28] sm:$0xff] }
  0xa3   :  { %3459 = vmatprep.subr.mxu0 %v4068_v19  ;;  %3493 = vmatprep.subr.mxu1 %v3977_v35 }
  0xa4   :  { %v1063_v33 = vand.u32 4294901760, %v4413_v27 }
  0xa6   :  { %3460 = vmatpush3.xpose.msra.mxu0 %v4068_v19  ;;  %3494 = vmatpush3.xpose.msra.mxu1 %v3977_v35  ;;  %v1064_v35 = vsub.f32 %v4413_v27, %v1063_v33 }
  0xa7   :  { %3461 = vmatprep.subr.mxu0 %v4084_v37  ;;  %3495 = vmatprep.subr.mxu1 %v4002_v46 }
  0xa8   :  { %v1065_v39 = vand.u32 4294901760, %v1064_v35 }
  0xaa   :  { %3462 = vmatpush3.xpose.msra.mxu0 %v4084_v37  ;;  %3496 = vmatpush3.xpose.msra.mxu1 %v4002_v46 }
  0xab   :  { %3463 = vmatprep.subr.mxu0 %v4100_v48  ;;  %3497 = vmatprep.subr.mxu1 %v4014_v51 }
  0xae   :  { %3464 = vmatpush3.xpose.msra.mxu0 %v4100_v48  ;;  %3498 = vmatpush3.xpose.msra.mxu1 %v4014_v51  ;;  %v59_v48 = vpop.permute.xlu1 %58 }
  0xaf   :  { %3465 = vmatprep.subr.mxu0 %v5005_v8  ;;  %3499 = vmatprep.subr.mxu1 %v4035_v61 }
  0xb2   :  { %3466 = vmatpush3.xpose.msra.mxu0 %v5005_v8  ;;  %3500 = vmatpush3.xpose.msra.mxu1 %v4035_v61  ;;  %v4440_v8 = vand.u32 4294901760, %v975_v60 }
  0xb3   :  { %3467 = vmatprep.subr.mxu0 %v5006_v9  ;;  %3501 = vmatprep.subr.mxu1 %v4055_v5 }
  0xb4   :  { %v74_v37 = vpop.permute.xlu0 %73 }
  0xb6   :  { %3468 = vmatpush3.xpose.msra.mxu0 %v5006_v9  ;;  %3502 = vmatpush3.xpose.msra.mxu1 %v4055_v5 }
  0xb7   :  { %3469 = vmatprep.subr.mxu0 %v5007_v10  ;;  %3503 = vmatprep.subr.mxu1 %v4074_v28 }
  0xba   :  { %3470 = vmatpush3.xpose.msra.mxu0 %v5007_v10  ;;  %3504 = vmatpush3.xpose.msra.mxu1 %v4074_v28 }
  0xbb   :  { %3471 = vmatprep.subr.mxu0 %v5008_v13  ;;  %3505 = vmatprep.subr.mxu1 %v4093_v41 }
  0xbe   :  { %3472 = vmatpush3.xpose.msra.mxu0 %v5008_v13  ;;  %3506 = vmatpush3.xpose.msra.mxu1 %v4093_v41 }
  0xbf   :  { %3473 = vmatprep.subr.mxu0 %v4192_v6  ;;  %3507 = vmatprep.subr.mxu1 %v4109_v53 }
  0xc2   :  { %3474 = vmatpush3.xpose.msra.mxu0 %v4192_v6  ;;  %3508 = vmatpush3.xpose.msra.mxu1 %v4109_v53  ;;  %v972_v6 = vsel %vm967_vm1, %v912_v47, 0 }
  0xc3   :  { %3509 = vmatprep.subr.mxu1 %v4128_v4  ;;  %v69_v53 = vpop.permute.xlu0 %68  ;;  %v4430_v15 = vand.u32 4294901760, %v972_v6 }
  0xc5   :  { %3476 = vmatmul.mubr.f32.vlgmr.msra.gmra.mxu0 %v4147_v31  ;;  %v4438_v1 = vsub.f32 %v972_v6, %v4430_v15 }
  0xc6   :  { %3510 = vmatpush3.xpose.msra.mxu1 %v4128_v4  ;;  %3478 = vmatprep.mubr.f32.mxu0 %v4163_v57 }
  0xc7   :  { %3511 = vmatprep.subr.mxu1 %v4151_v34 }
  0xc9   :  { %3479 = vmatmul.mubr.f32.gmra.mxu0 %v4168_v63 }
  0xca   :  { %3512 = vmatpush3.xpose.msra.mxu1 %v4151_v34  ;;  %3527 = vmatprep.mubr.f32.mxu0 %v1065_v39  ;;  %v4445_v39 = vand.u32 4294901760, %v978_v29 }
  0xcd   :  { %3514 = vmatmul.mubr.f32.vlgmr.msra.gmra.mxu1 %v4147_v31 }
  0xce   :  { %3516 = vmatprep.mubr.f32.mxu1 %v4163_v57 }
  0xd1   :  { %3517 = vmatmul.mubr.f32.gmra.mxu1 %v4168_v63 }
  0xd2   :  { %3547 = vmatprep.mubr.f32.mxu1 %v4410_v22 }
 0x105   :  { %v3325_v42 = vpop.f32.mrf.mxu0 }
 0x106   :  { %v235_v49 = vadd.f32 %v3325_v42, %v64_v7  ;;  %v981_v42 = vsel %vm967_vm1, %v915_v45, 0  ;;  %v4455_v7 = vsub.f32 %v975_v60, %v4440_v8 }
 0x107   :  { %v224_v46 = vpop.f32.mrf.mxu0 }
 0x108   :  { %v225_v26 = vadd.f32 %v224_v46, %v59_v48  ;;  %v1083_v47 = vand.u32 4294901760, %v4455_v7 }
 0x109   :  { %v3328_v51 = vpop.f32.mrf.mxu0 }
 0x10a   :  { %v255_v31 = vadd.f32 %v3328_v51, %v74_v37  ;;  %v1084_v3 = vsub.f32 %v4455_v7, %v1083_v47 }
 0x10b   :  { %v244_v58 = vpop.f32.mrf.mxu0 }
 0x10c   :  { %v245_v57 = vadd.f32 %v244_v58, %v69_v53  ;;  %v917_v58 = vld [vmem:[%s4979_s3 + $0x30] sm:$0xff] }
 0x10d   :  { %v3363_v52 = vpop.f32.mrf.mxu1  ;;  %v987_v53 = vsel %vm967_vm1, %v917_v58, 0 }
 0x10e   :  { %v412_v50 = vadd.f32 %v3363_v52, %v235_v49  ;;  %v4466_v49 = vsub.f32 %v978_v29, %v4445_v39 }
 0x10f   :  { %v405_v61 = vpop.f32.mrf.mxu1 }
 0x110   :  { %v406_v24 = vadd.f32 %v405_v61, %v225_v26 }
 0x111   :  { %v3366_v5 = vpop.f32.mrf.mxu1 }
 0x112   :  { %v424_v14 = vadd.f32 %v3366_v5, %v255_v31  ;;  %v1073_v5 = vand.u32 4294901760, %v4438_v1 }
 0x113   :  { %v417_v28 = vpop.f32.mrf.mxu1 }
 0x114   :  { %v418_v12 = vadd.f32 %v417_v28, %v245_v57 }
 0x145   :  { %v3401_v0 = vpop.f32.mrf.mxu0 }
 0x146   :  { %v535_v11 = vadd.f32 %v3401_v0, %v412_v50 }
 0x147   :  { %v527_v19 = vpop.f32.mrf.mxu0 }
 0x148   :  { %v528_v44 = vadd.f32 %v527_v19, %v406_v24  ;;  %v984_v19 = vsel %vm967_vm1, %v916_v21, 0  ;;  %v4488_v24 = vand.u32 4294901760, %v987_v53 }
 0x149   :  { %v3404_v38 = vpop.f32.mrf.mxu0  ;;  %v4471_v26 = vand.u32 4294901760, %v984_v19 }
 0x14a   :  { %v549_v16 = vadd.f32 %v3404_v38, %v424_v14  ;;  %v4458_v38 = vand.u32 4294901760, %v981_v42  ;;  %v1093_v14 = vand.u32 4294901760, %v4466_v49 }
 0x14b   :  { %v541_v62 = vpop.f32.mrf.mxu0 }
 0x14c   :  { %v542_v54 = vadd.f32 %v541_v62, %v418_v12  ;;  %v1094_v60 = vsub.f32 %v4466_v49, %v1093_v14 }
 0x14d   :  { %v3439_v41 = vpop.f32.mrf.mxu1 }
 0x14e   :  { %v646_v2 = vadd.f32 %v3439_v41, %v535_v11  ;;  %v918_v41 = vld [vmem:[%s4979_s3 + $0x38] sm:$0xff] }
 0x14f   :  { %v637_v4 = vpop.f32.mrf.mxu1  ;;  %v990_v50 = vsel %vm967_vm1, %v918_v41, 0 }
 0x150   :  { %v638_v17 = vadd.f32 %v637_v4, %v528_v44  ;;  %v4498_v44 = vsub.f32 %v984_v19, %v4471_v26  ;;  %v4500_v12 = vand.u32 4294901760, %v990_v50 }
 0x151   :  { %v3442_v55 = vpop.f32.mrf.mxu1 }
 0x152   :  { %v662_v36 = vadd.f32 %v3442_v55, %v549_v16 }
 0x153   :  { %v653_v40 = vpop.f32.mrf.mxu1 }
 0x154   :  { %v654_v9 = vadd.f32 %v653_v40, %v542_v54 }
 0x185   :  { %v3477_v34 = vpop.f32.mrf.mxu0 }
 0x186   :  { %v787_v23 = vadd.f32 %v3477_v34, %v646_v2  ;;  %v1074_v34 = vsub.f32 %v4438_v1, %v1073_v5 }
 0x187   :  { %v780_v63 = vpop.f32.mrf.mxu0 }
 0x188   :  { %v781_v30 = vadd.f32 %v780_v63, %v638_v17  ;;  %v4486_v63 = vsub.f32 %v981_v42, %v4458_v38  ;;  %v1075_v2 = vand.u32 4294901760, %v1074_v34 }
 0x189   :  { %v3480_v25 = vpop.f32.mrf.mxu0 }
 0x18a   :  { %v799_v10 = vadd.f32 %v3480_v25, %v662_v36  ;;  %v1103_v17 = vand.u32 4294901760, %v4486_v63  ;;  %v1113_v36 = vand.u32 4294901760, %v4498_v44 }
 0x18b   :  { %v792_v56 = vpop.f32.mrf.mxu0 }
 0x18c   :  { %v793_v46 = vadd.f32 %v792_v56, %v654_v9 }
 0x18d   :  { %v3515_v59 = vpop.f32.mrf.mxu1 }
 0x18e   :  { %v892_v43 = vadd.f32 %v3515_v59, %v787_v23  ;;  %v4515_v23 = vsub.f32 %v987_v53, %v4488_v24 }
 0x18f   :  { %v885_v20 = vpop.f32.mrf.mxu1 }
 0x190   :  { %v908_v13 = vmax.f32 %v892_v43, 0.0  ;;  %v886_v18 = vadd.f32 %v885_v20, %v781_v30  ;;  %v4527_v30 = vsub.f32 %v990_v50, %v4500_v12  ;;  %v1085_v43 = vand.u32 4294901760, %v1084_v3  ;;  %v965_v3 = vpop.permute.xlu0 %964 }
 0x191   :  { %v3518_v35 = vpop.f32.mrf.mxu1  ;;  %v1104_v20 = vsub.f32 %v4486_v63, %v1103_v17  ;;  %v1123_v9 = vand.u32 4294901760, %v4515_v23 }
 0x192   :  { %v907_v51 = vmax.f32 %v886_v18, 0.0  ;;  %v904_v52 = vadd.f32 %v3518_v35, %v799_v10  ;;  %v4451_v61 = vand.u32 4294901760, %v908_v13  ;;  %v1095_v10 = vand.u32 4294901760, %v1094_v60 }
 0x193   :  { %v897_v0 = vpop.f32.mrf.mxu1  ;;  %v1114_v18 = vsub.f32 %v4498_v44, %v1113_v36  ;;  %v1133_v21 = vand.u32 4294901760, %v4527_v30  ;;  %v1105_v42 = vand.u32 4294901760, %v1104_v20 }
 0x194   :  { %v910_v28 = vmax.f32 %v904_v52, 0.0  ;;  %v898_v37 = vadd.f32 %v897_v0, %v793_v46  ;;  %v4463_v48 = vand.u32 4294901760, %v907_v51  ;;  %v4474_v31 = vsub.f32 %v908_v13, %v4451_v61 }
 0x195   :  { %v1124_v46 = vsub.f32 %v4515_v23, %v1123_v9  ;;  %v1115_v52 = vand.u32 4294901760, %v1114_v18  ;;  %v1134_v58 = vsub.f32 %v4527_v30, %v1133_v21 }
 0x196   :  { %v4469_v62 = vand.u32 4294901760, %v910_v28  ;;  %v909_v4 = vmax.f32 %v898_v37, 0.0  ;;  %v1188_v11 = vsub.f32 %v907_v51, %v4463_v48  ;;  %v4507_v40 = vand.u32 4294901760, %v4474_v31 }
 0x197   :  { %v1125_v0 = vand.u32 4294901760, %v1124_v46  ;;  %v1135_v19 = vand.u32 4294901760, %v1134_v58 }
 0x198   :  { %v1167_v57 = vsub.f32 %v910_v28, %v4469_v62  ;;  %v4482_v55 = vand.u32 4294901760, %v909_v4  ;;  %3519 = vmatprep.subr.mxu0 %v4469_v62  ;;  %v4521_v59 = vand.u32 4294901760, %v1188_v11  ;;  %v1183_v45 = vsub.f32 %v4474_v31, %v4507_v40 }
 0x199   :  { %3520 = vmatpush3.msra.mxu0 %v4469_v62 }
 0x19a   :  { %v1174_v6 = vsub.f32 %v909_v4, %v4482_v55  ;;  %3521 = vmatprep.subr.mxu0 %v4482_v55  ;;  %v4495_v32 = vand.u32 4294901760, %v1167_v57  ;;  %v1190_v13 = vsub.f32 %v1188_v11, %v4521_v59  ;;  %v1184_v35 = vand.u32 4294901760, %v1183_v45 }
 0x19b   :  { %3522 = vmatpush3.msra.mxu0 %v4482_v55 }
 0x19c   :  { %3523 = vmatprep.subr.mxu0 %v4451_v61  ;;  %v1169_v25 = vsub.f32 %v1167_v57, %v4495_v32  ;;  %v4511_v16 = vand.u32 4294901760, %v1174_v6  ;;  %v1191_v51 = vand.u32 4294901760, %v1190_v13 }
 0x19d   :  { %3524 = vmatpush3.msra.mxu0 %v4451_v61 }
 0x19e   :  { %3525 = vmatprep.subr.mxu0 %v4463_v48  ;;  %v1170_v29 = vand.u32 4294901760, %v1169_v25  ;;  %v1176_v54 = vsub.f32 %v1174_v6, %v4511_v16 }
 0x19f   :  { %3526 = vmatpush3.msra.mxu0 %v4463_v48 }
 0x1a0   :  { %3528 = vmatmul.mubr.f32.vlgmr.msra.gmra.mxu0 %v1075_v2  ;;  %3539 = vmatprep.subr.mxu1 %v1170_v29  ;;  %v1177_v56 = vand.u32 4294901760, %v1176_v54 }
 0x1a1   :  { %3559 = vmatprep.subr.mxu0 %v1167_v57  ;;  %3540 = vmatpush3.msra.mxu1 %v1170_v29  ;;  %v955_v29 = vpop.permute.xlu0 %954 }
 0x1a2   :  { %3560 = vmatpush3.msra.mxu0 %v1167_v57  ;;  %3541 = vmatprep.subr.mxu1 %v1177_v56 }
 0x1a3   :  { %3561 = vmatprep.subr.mxu0 %v1174_v6  ;;  %3530 = vmatprep.mubr.f32.mxu0 %v1085_v43 }
 0x1a4   :  { %3542 = vmatpush3.msra.mxu1 %v1177_v56  ;;  %3562 = vmatpush3.msra.mxu0 %v1174_v6 }
 0x1a5   :  { %3531 = vmatmul.mubr.f32.gmra.mxu0 %v1095_v10  ;;  %3543 = vmatprep.subr.mxu1 %v1184_v35 }
 0x1a6   :  { %3563 = vmatprep.subr.mxu0 %v4474_v31  ;;  %3544 = vmatpush3.msra.mxu1 %v1184_v35 }
 0x1a7   :  { %3564 = vmatpush3.msra.mxu0 %v4474_v31  ;;  %3545 = vmatprep.subr.mxu1 %v1191_v51 }
 0x1a8   :  { %3565 = vmatprep.subr.mxu0 %v1188_v11  ;;  %3533 = vmatprep.mubr.f32.mxu0 %v1105_v42 }
 0x1a9   :  { %3546 = vmatpush3.msra.mxu1 %v1191_v51  ;;  %3566 = vmatpush3.msra.mxu0 %v1188_v11 }
 0x1aa   :  { %3534 = vmatmul.mubr.f32.gmra.mxu0 %v1115_v52  ;;  %3548 = vmatmul.mubr.f32.vlgmr.msra.gmra.mxu1 %v4430_v15 }
 0x1ab   :  { %3579 = vmatprep.subr.mxu1 %v4469_v62  ;;  %3599 = vmatprep.subr.mxu0 %v4495_v32 }
 0x1ac   :  { %3580 = vmatpush3.msra.mxu1 %v4469_v62  ;;  %3536 = vmatprep.mubr.f32.mxu0 %v1125_v0 }
 0x1ad   :  { %3581 = vmatprep.subr.mxu1 %v4482_v55  ;;  %3550 = vmatprep.mubr.f32.mxu1 %v4440_v8 }
 0x1ae   :  { %3582 = vmatpush3.msra.mxu1 %v4482_v55  ;;  %3537 = vmatmul.mubr.f32.gmra.mxu0 %v1135_v19 }
 0x1af   :  { %3551 = vmatmul.mubr.f32.gmra.mxu1 %v4445_v39  ;;  %3583 = vmatprep.subr.mxu1 %v4451_v61 }
 0x1b0   :  { %3584 = vmatpush3.msra.mxu1 %v4451_v61  ;;  %3553 = vmatprep.mubr.f32.mxu1 %v4458_v38 }
 0x1b1   :  { %3585 = vmatprep.subr.mxu1 %v4463_v48  ;;  %3567 = vmatprep.mubr.f32.mxu0 %v4413_v27 }
 0x1b2   :  { %3586 = vmatpush3.msra.mxu1 %v4463_v48  ;;  %3568 = vmatmul.mubr.f32.vlgmr.msra.gmra.mxu0 %v4438_v1 }
 0x1b3   :  { %3554 = vmatmul.mubr.f32.gmra.mxu1 %v4471_v26  ;;  %3600 = vmatpush3.msra.mxu0 %v4495_v32 }
 0x1b4   :  { %3619 = vmatprep.subr.mxu1 %v4469_v62  ;;  %3601 = vmatprep.subr.mxu0 %v4511_v16 }
 0x1b5   :  { %3602 = vmatpush3.msra.mxu0 %v4511_v16  ;;  %3556 = vmatprep.mubr.f32.mxu1 %v4488_v24  ;;  %v960_v16 = vpop.permute.xlu1 %959 }
 0x1b6   :  { %3570 = vmatprep.mubr.f32.mxu0 %v4455_v7  ;;  %3603 = vmatprep.subr.mxu0 %v4507_v40 }
 0x1b7   :  { %3557 = vmatmul.mubr.f32.gmra.mxu1 %v4500_v12  ;;  %3571 = vmatmul.mubr.f32.gmra.mxu0 %v4466_v49 }
 0x1b8   :  { %3604 = vmatpush3.msra.mxu0 %v4507_v40  ;;  %3573 = vmatprep.mubr.f32.mxu0 %v4486_v63 }
 0x1b9   :  { %3605 = vmatprep.subr.mxu0 %v4521_v59  ;;  %3587 = vmatprep.mubr.f32.mxu1 %v1063_v33  ;;  %v1787_v33 = vld [vmem:[%s4980_s5 + $0x8] sm:$0xff] }
 0x1ba   :  { %3606 = vmatpush3.msra.mxu0 %v4521_v59  ;;  %v4628_v1 = vsel %vm1814_vm2, %v1787_v33, 0 }
 0x1bb   :  { %3574 = vmatmul.mubr.f32.gmra.mxu0 %v4498_v44  ;;  %3588 = vmatmul.mubr.f32.vlgmr.msra.gmra.mxu1 %v1073_v5  ;;  %v1789_v5 = vld [vmem:[%s4980_s5 + $0x18] sm:$0xff] }
 0x1bc   :  { %3620 = vmatpush3.msra.mxu1 %v4469_v62  ;;  %3576 = vmatprep.mubr.f32.mxu0 %v4515_v23  ;;  %v4643_v28 = vsel %vm1814_vm2, %v1789_v5, 0 }
 0x1bd   :  { %3621 = vmatprep.subr.mxu1 %v4482_v55  ;;  %3590 = vmatprep.mubr.f32.mxu1 %v1083_v47  ;;  %5011 = vst [vmem:[#allocation4_spill] sm:$0xff] %v4643_v28 }
 0x1be   :  { %3622 = vmatpush3.msra.mxu1 %v4482_v55 }
 0x1bf   :  { %3623 = vmatprep.subr.mxu1 %v4451_v61  ;;  %3577 = vmatmul.mubr.f32.gmra.mxu0 %v4527_v30  ;;  %v950_v30 = vpop.permute.xlu1 %949 }
 0x1c0   :  { %3591 = vmatmul.mubr.f32.gmra.mxu1 %v1093_v14  ;;  %3607 = vmatprep.mubr.f32.mxu0 %v4410_v22 }
 0x1c1   :  { %3624 = vmatpush3.msra.mxu1 %v4451_v61  ;;  %3593 = vmatprep.mubr.f32.mxu1 %v1103_v17 }
 0x1c2   :  { %3625 = vmatprep.subr.mxu1 %v4463_v48 }
 0x1c3   :  { %3626 = vmatpush3.msra.mxu1 %v4463_v48  ;;  %3608 = vmatmul.mubr.f32.vlgmr.msra.gmra.mxu0 %v4430_v15  ;;  %v940_v18 = vpop.permute.xlu1 %939 }
 0x1c4   :  { %3594 = vmatmul.mubr.f32.gmra.mxu1 %v1113_v36  ;;  %3610 = vmatprep.mubr.f32.mxu0 %v4440_v8 }
 0x1c5   :  { %3596 = vmatprep.mubr.f32.mxu1 %v1123_v9  ;;  %v945_v9 = vpop.permute.xlu0 %944 }
 0x1c7   :  { %3611 = vmatmul.mubr.f32.gmra.mxu0 %v4445_v39 }
 0x1c8   :  { %3597 = vmatmul.mubr.f32.gmra.mxu1 %v1133_v21  ;;  %3613 = vmatprep.mubr.f32.mxu0 %v4458_v38 }
 0x1c9   :  { %3627 = vmatprep.mubr.f32.mxu1 %v4410_v22  ;;  %v1786_v22 = vld [vmem:[%s4980_s5] sm:$0xff]  ;;  %v935_v33 = vpop.permute.xlu0 %934 }
 0x1ca   :  { %v1816_v27 = vsel %vm1814_vm2, %v1786_v22, 0 }
 0x1cb   :  { %3614 = vmatmul.mubr.f32.gmra.mxu0 %v4471_v26 }
 0x1cc   :  { %3628 = vmatmul.mubr.f32.vlgmr.msra.gmra.mxu1 %v4430_v15  ;;  %3616 = vmatprep.mubr.f32.mxu0 %v4488_v24  ;;  %v4626_v15 = vand.u32 4294901760, %v1816_v27 }
 0x1cd   :  { %3630 = vmatprep.mubr.f32.mxu1 %v4440_v8 }
 0x1ce   :  { %5009 = vst [vmem:[#allocation2_spill] sm:$0xff] %v4626_v15  ;;  %v4631_v8 = vsub.f32 %v1816_v27, %v4626_v15 }
 0x1cf   :  { %3617 = vmatmul.mubr.f32.gmra.mxu0 %v4500_v12 }
 0x1d0   :  { %3631 = vmatmul.mubr.f32.gmra.mxu1 %v4445_v39  ;;  %5010 = vst [vmem:[#allocation3_spill] sm:$0xff] %v4631_v8  ;;  %v1788_v39 = vld [vmem:[%s4980_s5 + $0x10] sm:$0xff]  ;;  %v4993_v7 = vand.u32 4294901760, %v4631_v8 }
 0x1d1   :  { %3633 = vmatprep.mubr.f32.mxu1 %v4458_v38  ;;  %v4637_v61 = vsel %vm1814_vm2, %v1788_v39, 0 }
 0x1d2   :  { %v1903_v37 = vsub.f32 %v4631_v8, %v4993_v7 }
 0x1d4   :  { %3634 = vmatmul.mubr.f32.gmra.mxu1 %v4471_v26  ;;  %v1904_v38 = vand.u32 4294901760, %v1903_v37 }
 0x1d5   :  { %3636 = vmatprep.mubr.f32.mxu1 %v4488_v24 }
 0x1d6   :  { %3655 = vmatprep.mubr.f32.mxu0 %v1904_v38 }
 0x1d8   :  { %3637 = vmatmul.mubr.f32.gmra.mxu1 %v4500_v12 }
 0x1d9   :  { %3677 = vmatprep.mubr.f32.mxu1 %v4626_v15 }
 0x260   :  { %v3529_v41 = vpop.f32.mrf.mxu0 }
 0x261   :  { %v1078_v7 = vadd.f32 %v3529_v41, %v935_v33  ;;  %v4694_v33 = vand.u32 4294901760, %v4637_v61 }
 0x262   :  { %v4648_v48 = vpop.f32.mrf.mxu0 }
 0x265   :  { %v3532_v49 = vpop.f32.mrf.mxu0 }
 0x266   :  { %v1098_v21 = vadd.f32 %v3532_v49, %v945_v9  ;;  %v930_v49 = vpop.permute.xlu1 %929 }
 0x267   :  { %v1087_v53 = vpop.f32.mrf.mxu0 }
 0x268   :  { %v1088_v51 = vadd.f32 %v1087_v53, %v940_v18 }
 0x26a   :  { %v3535_v62 = vpop.f32.mrf.mxu0  ;;  %v4650_v4 = vpop.f32.mrf.mxu1 }
 0x26b   :  { %v1118_v35 = vadd.f32 %v3535_v62, %v955_v29 }
 0x26c   :  { %v1107_v26 = vpop.f32.mrf.mxu0  ;;  %v4652_v31 = vpop.f32.mrf.mxu1 }
 0x26d   :  { %v1108_v52 = vadd.f32 %v1107_v26, %v950_v30 }
 0x26e   :  { %v3538_v34 = vpop.f32.mrf.mxu0 }
 0x26f   :  { %v3552_v47 = vpop.f32.mrf.mxu1  ;;  %v1138_v22 = vadd.f32 %v3538_v34, %v965_v3  ;;  %v1235_v34 = vadd.f32 %v4650_v4, %v1078_v7 }
 0x270   :  { %v1127_v50 = vpop.f32.mrf.mxu0  ;;  %v1247_v58 = vadd.f32 %v3552_v47, %v1098_v21  ;;  %v1068_v47 = vadd.f32 %v4648_v48, %v930_v49 }
 0x271   :  { %v1240_v57 = vpop.f32.mrf.mxu1  ;;  %v1128_v15 = vadd.f32 %v1127_v50, %v960_v16 }
 0x272   :  { %v4654_v55 = vpop.f32.mrf.mxu0  ;;  %v1241_v39 = vadd.f32 %v1240_v57, %v1088_v51  ;;  %v1229_v50 = vadd.f32 %v4652_v31, %v1068_v47 }
 0x273   :  { %v3555_v63 = vpop.f32.mrf.mxu1 }
 0x274   :  { %v4656_v24 = vpop.f32.mrf.mxu0  ;;  %v1259_v0 = vadd.f32 %v3555_v63, %v1118_v35  ;;  %v4678_v35 = vand.u32 4294901760, %v4628_v1 }
 0x275   :  { %v1252_v11 = vpop.f32.mrf.mxu1 }
 0x276   :  { %v1253_v5 = vadd.f32 %v1252_v11, %v1108_v52 }
 0x277   :  { %v3558_v14 = vpop.f32.mrf.mxu1  ;;  %v3572_v6 = vpop.f32.mrf.mxu0 }
 0x278   :  { %v1372_v37 = vadd.f32 %v3572_v6, %v1247_v58  ;;  %v1271_v8 = vadd.f32 %v3558_v14, %v1138_v22  ;;  %v1358_v14 = vadd.f32 %v4654_v55, %v1235_v34  ;;  %v4730_v34 = vsub.f32 %v4637_v61, %v4694_v33 }
 0x279   :  { %v1264_v32 = vpop.f32.mrf.mxu1  ;;  %v1364_v44 = vpop.f32.mrf.mxu0 }
 0x27a   :  { %v1365_v62 = vadd.f32 %v1364_v44, %v1241_v39  ;;  %v1265_v63 = vadd.f32 %v1264_v32, %v1128_v15  ;;  %v1351_v15 = vadd.f32 %v4656_v24, %v1229_v50 }
 0x27b   :  { %v3575_v12 = vpop.f32.mrf.mxu0  ;;  %v4658_v2 = vpop.f32.mrf.mxu1 }
 0x27c   :  { %v1386_v38 = vadd.f32 %v3575_v12, %v1259_v0 }
 0x27d   :  { %v1378_v40 = vpop.f32.mrf.mxu0  ;;  %v4660_v25 = vpop.f32.mrf.mxu1 }
 0x27e   :  { %v1379_v29 = vadd.f32 %v1378_v40, %v1253_v5  ;;  %v1477_v55 = vadd.f32 %v4660_v25, %v1351_v15 }
 0x27f   :  { %v3578_v17 = vpop.f32.mrf.mxu0 }
 0x280   :  { %v3592_v23 = vpop.f32.mrf.mxu1  ;;  %v1400_v3 = vadd.f32 %v3578_v17, %v1271_v8  ;;  %v1485_v8 = vadd.f32 %v4658_v2, %v1358_v14 }
 0x281   :  { %v1392_v60 = vpop.f32.mrf.mxu0  ;;  %v1501_v9 = vadd.f32 %v3592_v23, %v1372_v37 }
 0x282   :  { %v1492_v59 = vpop.f32.mrf.mxu1  ;;  %v1393_v44 = vadd.f32 %v1392_v60, %v1265_v63 }
 0x283   :  { %v4662_v54 = vpop.f32.mrf.mxu0  ;;  %v1493_v11 = vadd.f32 %v1492_v59, %v1365_v62 }
 0x284   :  { %v3595_v36 = vpop.f32.mrf.mxu1  ;;  %v1622_v60 = vadd.f32 %v4662_v54, %v1485_v8 }
 0x285   :  { %v4664_v43 = vpop.f32.mrf.mxu0  ;;  %v1517_v53 = vadd.f32 %v3595_v36, %v1386_v38 }
 0x286   :  { %v1508_v45 = vpop.f32.mrf.mxu1  ;;  %v1616_v24 = vadd.f32 %v4664_v43, %v1477_v55 }
 0x287   :  { %v3612_v56 = vpop.f32.mrf.mxu0  ;;  %v1509_v6 = vadd.f32 %v1508_v45, %v1379_v29 }
 0x288   :  { %v3598_v20 = vpop.f32.mrf.mxu1  ;;  %v1634_v12 = vadd.f32 %v3612_v56, %v1501_v9 }
 0x289   :  { %v1627_v10 = vpop.f32.mrf.mxu0  ;;  %v1533_v40 = vadd.f32 %v3598_v20, %v1400_v3 }
 0x28a   :  { %v1524_v13 = vpop.f32.mrf.mxu1  ;;  %v1628_v23 = vadd.f32 %v1627_v10, %v1493_v11 }
 0x28b   :  { %v3615_v42 = vpop.f32.mrf.mxu0  ;;  %v1525_v7 = vadd.f32 %v1524_v13, %v1393_v44 }
 0x28c   :  { %v3629_v46 = vpop.f32.mrf.mxu1  ;;  %v1646_v41 = vadd.f32 %v3615_v42, %v1517_v53 }
 0x28d   :  { %v1639_v19 = vpop.f32.mrf.mxu0  ;;  %v1739_v2 = vadd.f32 %v3629_v46, %v1622_v60  ;;  %v4691_v46 = vsub.f32 %v4628_v1, %v4678_v35  ;;  %v5012_v1 = vld [vmem:[#allocation4_spill] sm:$0xff] }
 0x28e   :  { %v1732_v27 = vpop.f32.mrf.mxu1  ;;  %v1640_v36 = vadd.f32 %v1639_v19, %v1509_v6  ;;  %v4709_v49 = vand.u32 4294901760, %v5012_v1 }
 0x28f   :  { %v3618_v26 = vpop.f32.mrf.mxu0  ;;  %v1733_v54 = vadd.f32 %v1732_v27, %v1616_v24  ;;  %v1779_v43 = vmax.f32 %v1739_v2, 0.0  ;;  %v1912_v47 = vand.u32 4294901760, %v4691_v46 }
 0x290   :  { %v3632_v28 = vpop.f32.mrf.mxu1  ;;  %v1658_v32 = vadd.f32 %v3618_v26, %v1533_v40  ;;  %v4749_v61 = vsub.f32 %v5012_v1, %v4709_v49  ;;  %v1922_v40 = vand.u32 4294901760, %v4730_v34 }
 0x291   :  { %v1751_v30 = vadd.f32 %v3632_v28, %v1634_v12  ;;  %v1651_v48 = vpop.f32.mrf.mxu0  ;;  %v1778_v38 = vmax.f32 %v1733_v54, 0.0  ;;  %v4724_v26 = vand.u32 4294901760, %v1779_v43 }
 0x292   :  { %v1744_v57 = vpop.f32.mrf.mxu1  ;;  %v1652_v45 = vadd.f32 %v1651_v48, %v1525_v7  ;;  %v1923_v7 = vsub.f32 %v4730_v34, %v1922_v40 }
 0x293   :  { %v1745_v17 = vadd.f32 %v1744_v57, %v1628_v23  ;;  %v1781_v20 = vmax.f32 %v1751_v30, 0.0  ;;  %v4744_v6 = vand.u32 4294901760, %v1778_v38  ;;  %v4760_v44 = vsub.f32 %v1779_v43, %v4724_v26 }
 0x294   :  { %v3635_v16 = vpop.f32.mrf.mxu1 }
 0x295   :  { %v1763_v18 = vadd.f32 %v3635_v16, %v1646_v41  ;;  %v1780_v42 = vmax.f32 %v1745_v17, 0.0  ;;  %v4682_v58 = vand.u32 4294901760, %v1781_v20  ;;  %v4774_v48 = vsub.f32 %v1778_v38, %v4744_v6 }
 0x296   :  { %v1756_v4 = vpop.f32.mrf.mxu1 }
 0x297   :  { %v1783_v59 = vmax.f32 %v1763_v18, 0.0  ;;  %v1757_v31 = vadd.f32 %v1756_v4, %v1640_v36  ;;  %v4696_v39 = vand.u32 4294901760, %v1780_v42  ;;  %v4712_v62 = vsub.f32 %v1781_v20, %v4682_v58 }
 0x298   :  { %v3638_v56 = vpop.f32.mrf.mxu1  ;;  %v1913_v36 = vsub.f32 %v4691_v46, %v1912_v47  ;;  %v1932_v18 = vand.u32 4294901760, %v4749_v61  ;;  %v4786_v4 = vand.u32 4294901760, %v4760_v44  ;;  %v4796_v55 = vand.u32 4294901760, %v4774_v48 }
 0x299   :  { %v4674_v28 = vand.u32 4294901760, %v1783_v59  ;;  %v1782_v10 = vmax.f32 %v1757_v31, 0.0  ;;  %v1775_v21 = vadd.f32 %v3638_v56, %v1658_v32  ;;  %v4733_v63 = vsub.f32 %v1780_v42, %v4696_v39 }
 0x29a   :  { %v1768_v13 = vpop.f32.mrf.mxu1  ;;  %v4757_v14 = vand.u32 4294901760, %v4712_v62  ;;  %v1914_v17 = vand.u32 4294901760, %v1913_v36  ;;  %v1933_v31 = vsub.f32 %v4749_v61, %v1932_v18  ;;  %v2002_v56 = vsub.f32 %v4760_v44, %v4786_v4 }
 0x29b   :  { %v4680_v51 = vand.u32 4294901760, %v1782_v10  ;;  %v1785_v25 = vmax.f32 %v1775_v21, 0.0  ;;  %v1769_v52 = vadd.f32 %v1768_v13, %v1652_v45  ;;  %v4685_v0 = vsub.f32 %v1783_v59, %v4674_v28  ;;  %v5013_v13 = vld [vmem:[#allocation3_spill] sm:$0xff] }
 0x29c   :  { %v4771_v30 = vand.u32 4294901760, %v4733_v63  ;;  %v1988_v8 = vsub.f32 %v4712_v62, %v4757_v14  ;;  %v1924_v45 = vand.u32 4294901760, %v1923_v7  ;;  %v2009_v21 = vsub.f32 %v4774_v48, %v4796_v55 }
 0x29d   :  { %v4687_v19 = vand.u32 4294901760, %v1785_v25  ;;  %v1784_v22 = vmax.f32 %v1769_v52, 0.0  ;;  %v4699_v27 = vsub.f32 %v1782_v10, %v4680_v51  ;;  %v4722_v53 = vand.u32 4294901760, %v4685_v0 }
 0x29e   :  { %v1995_v59 = vsub.f32 %v4733_v63, %v4771_v30  ;;  %v1989_v60 = vand.u32 4294901760, %v1988_v8  ;;  %v1934_v10 = vand.u32 4294901760, %v1933_v31  ;;  %v2003_v24 = vand.u32 4294901760, %v2002_v56 }
 0x29f   :  { %v4702_v5 = vsub.f32 %v1785_v25, %v4687_v19  ;;  %v4704_v37 = vand.u32 4294901760, %v1784_v22  ;;  %3639 = vmatprep.subr.mxu0 %v4687_v19  ;;  %v4742_v11 = vand.u32 4294901760, %v4699_v27  ;;  %v1974_v50 = vsub.f32 %v4685_v0, %v4722_v53  ;;  %v5015_v25 = vld [vmem:[#allocation2_spill] sm:$0xff] }
 0x2a0   :  { %3640 = vmatpush3.msra.mxu0 %v4687_v19  ;;  %v1996_v20 = vand.u32 4294901760, %v1995_v59  ;;  %v2010_v2 = vand.u32 4294901760, %v2009_v21  ;;  %v5014_v42 = vand.u32 4294901760, %v5013_v13 }
 0x2a1   :  { %v4715_v29 = vsub.f32 %v1784_v22, %v4704_v37  ;;  %3641 = vmatprep.subr.mxu0 %v4704_v37  ;;  %v4719_v9 = vand.u32 4294901760, %v4702_v5  ;;  %v1981_v23 = vsub.f32 %v4699_v27, %v4742_v11  ;;  %v1975_v15 = vand.u32 4294901760, %v1974_v50 }
 0x2a2   :  { %3642 = vmatpush3.msra.mxu0 %v4704_v37 }
 0x2a3   :  { %3643 = vmatprep.subr.mxu0 %v4674_v28  ;;  %v1960_v3 = vsub.f32 %v4702_v5, %v4719_v9  ;;  %v4739_v57 = vand.u32 4294901760, %v4715_v29  ;;  %v1982_v32 = vand.u32 4294901760, %v1981_v23 }
 0x2a4   :  { %3644 = vmatpush3.msra.mxu0 %v4674_v28 }
 0x2a5   :  { %3645 = vmatprep.subr.mxu0 %v4680_v51  ;;  %v1961_v12 = vand.u32 4294901760, %v1960_v3  ;;  %v1967_v41 = vsub.f32 %v4715_v29, %v4739_v57 }
 0x2a6   :  { %3646 = vmatpush3.msra.mxu0 %v4680_v51 }
 0x2a7   :  { %3647 = vmatprep.subr.mxu0 %v4682_v58  ;;  %3661 = vmatprep.subr.mxu1 %v1961_v12  ;;  %v1968_v16 = vand.u32 4294901760, %v1967_v41 }
 0x2a8   :  { %3648 = vmatpush3.msra.mxu0 %v4682_v58  ;;  %3662 = vmatpush3.msra.mxu1 %v1961_v12 }
 0x2a9   :  { %3649 = vmatprep.subr.mxu0 %v4696_v39  ;;  %3663 = vmatprep.subr.mxu1 %v1968_v16 }
 0x2aa   :  { %3650 = vmatpush3.msra.mxu0 %v4696_v39  ;;  %3664 = vmatpush3.msra.mxu1 %v1968_v16 }
 0x2ab   :  { %3651 = vmatprep.subr.mxu0 %v4724_v26  ;;  %3665 = vmatprep.subr.mxu1 %v1975_v15 }
 0x2ac   :  { %3652 = vmatpush3.msra.mxu0 %v4724_v26  ;;  %3666 = vmatpush3.msra.mxu1 %v1975_v15 }
 0x2ad   :  { %3653 = vmatprep.subr.mxu0 %v4744_v6  ;;  %3667 = vmatprep.subr.mxu1 %v1982_v32 }
 0x2ae   :  { %3654 = vmatpush3.msra.mxu0 %v4744_v6  ;;  %3668 = vmatpush3.msra.mxu1 %v1982_v32 }
 0x2af   :  { %3656 = vmatmul.mubr.f32.vlgmr.msra.gmra.mxu0 %v1914_v17  ;;  %3669 = vmatprep.subr.mxu1 %v1989_v60 }
 0x2b0   :  { %3683 = vmatprep.subr.mxu0 %v4702_v5  ;;  %3670 = vmatpush3.msra.mxu1 %v1989_v60 }
 0x2b1   :  { %3684 = vmatpush3.msra.mxu0 %v4702_v5  ;;  %3671 = vmatprep.subr.mxu1 %v1996_v20 }
 0x2b2   :  { %3685 = vmatprep.subr.mxu0 %v4715_v29  ;;  %3658 = vmatprep.mubr.f32.mxu0 %v1924_v45 }
 0x2b3   :  { %3672 = vmatpush3.msra.mxu1 %v1996_v20  ;;  %3686 = vmatpush3.msra.mxu0 %v4715_v29 }
 0x2b4   :  { %3659 = vmatmul.mubr.f32.gmra.mxu0 %v1934_v10  ;;  %3673 = vmatprep.subr.mxu1 %v2003_v24 }
 0x2b5   :  { %3687 = vmatprep.subr.mxu0 %v4685_v0  ;;  %3674 = vmatpush3.msra.mxu1 %v2003_v24 }
 0x2b6   :  { %3688 = vmatpush3.msra.mxu0 %v4685_v0  ;;  %3675 = vmatprep.subr.mxu1 %v2010_v2 }
 0x2b7   :  { %3689 = vmatprep.subr.mxu0 %v4699_v27  ;;  %3676 = vmatpush3.msra.mxu1 %v2010_v2 }
 0x2b8   :  { %3690 = vmatpush3.msra.mxu0 %v4699_v27  ;;  %3678 = vmatmul.mubr.f32.vlgmr.msra.gmra.mxu1 %v4678_v35  ;;  %v1807_v27 = vpop.permute.xlu1 %1806 }
 0x2b9   :  { %3691 = vmatprep.subr.mxu0 %v4712_v62  ;;  %3705 = vmatprep.subr.mxu1 %v4687_v19 }
 0x2ba   :  { %3692 = vmatpush3.msra.mxu0 %v4712_v62  ;;  %3706 = vmatpush3.msra.mxu1 %v4687_v19 }
 0x2bb   :  { %3693 = vmatprep.subr.mxu0 %v4733_v63  ;;  %3707 = vmatprep.subr.mxu1 %v4704_v37 }
 0x2bc   :  { %3680 = vmatprep.mubr.f32.mxu1 %v4694_v33  ;;  %3694 = vmatpush3.msra.mxu0 %v4733_v63  ;;  %v1797_v29 = vpop.permute.xlu1 %1796 }
 0x2bd   :  { %3708 = vmatpush3.msra.mxu1 %v4704_v37  ;;  %3695 = vmatprep.subr.mxu0 %v4760_v44 }
 0x2be   :  { %3681 = vmatmul.mubr.f32.gmra.mxu1 %v4709_v49  ;;  %3709 = vmatprep.subr.mxu1 %v4674_v28 }
 0x2bf   :  { %3696 = vmatpush3.msra.mxu0 %v4760_v44  ;;  %3710 = vmatpush3.msra.mxu1 %v4674_v28 }
 0x2c0   :  { %3697 = vmatprep.subr.mxu0 %v4774_v48  ;;  %3711 = vmatprep.subr.mxu1 %v4680_v51 }
 0x2c1   :  { %3698 = vmatpush3.msra.mxu0 %v4774_v48  ;;  %3699 = vmatprep.mubr.f32.mxu0 %v5013_v13 }
 0x2c2   :  { %3712 = vmatpush3.msra.mxu1 %v4680_v51  ;;  %3700 = vmatmul.mubr.f32.vlgmr.msra.gmra.mxu0 %v4691_v46  ;;  %v1812_v46 = vpop.permute.xlu0 %1811 }
 0x2c3   :  { %3713 = vmatprep.subr.mxu1 %v4682_v58  ;;  %3727 = vmatprep.subr.mxu0 %v4719_v9 }
 0x2c4   :  { %3714 = vmatpush3.msra.mxu1 %v4682_v58  ;;  %3728 = vmatpush3.msra.mxu0 %v4719_v9  ;;  %v2497_v9 = vld [vmem:[%s4981_s7] sm:$0x7] }
 0x2c5   :  { %3715 = vmatprep.subr.mxu1 %v4696_v39  ;;  %3729 = vmatprep.subr.mxu0 %v4739_v57 }
 0x2c6   :  { %3702 = vmatprep.mubr.f32.mxu0 %v4730_v34  ;;  %3716 = vmatpush3.msra.mxu1 %v4696_v39  ;;  %v1802_v38 = vpop.permute.xlu0 %1801 }
 0x2c7   :  { %3730 = vmatpush3.msra.mxu0 %v4739_v57  ;;  %3717 = vmatprep.subr.mxu1 %v4724_v26 }
 0x2c8   :  { %3703 = vmatmul.mubr.f32.gmra.mxu0 %v4749_v61  ;;  %3731 = vmatprep.subr.mxu0 %v4722_v53 }
 0x2c9   :  { %3718 = vmatpush3.msra.mxu1 %v4724_v26  ;;  %3732 = vmatpush3.msra.mxu0 %v4722_v53 }
 0x2ca   :  { %3719 = vmatprep.subr.mxu1 %v4744_v6  ;;  %3733 = vmatprep.subr.mxu0 %v4742_v11 }
 0x2cb   :  { %3720 = vmatpush3.msra.mxu1 %v4744_v6  ;;  %3721 = vmatprep.mubr.f32.mxu1 %v5014_v42 }
 0x2cc   :  { %3734 = vmatpush3.msra.mxu0 %v4742_v11  ;;  %3722 = vmatmul.mubr.f32.vlgmr.msra.gmra.mxu1 %v1912_v47  ;;  %v2505_v11 = vsel %vm967_vm1, %v2497_v9, 0 }
 0x2cd   :  { %3735 = vmatprep.subr.mxu0 %v4757_v14  ;;  %3749 = vmatprep.subr.mxu1 %v4687_v19  ;;  %v4901_v44 = vand.u32 4294901760, %v2505_v11 }
 0x2ce   :  { %3736 = vmatpush3.msra.mxu0 %v4757_v14  ;;  %3750 = vmatpush3.msra.mxu1 %v4687_v19 }
 0x2cf   :  { %3737 = vmatprep.subr.mxu0 %v4771_v30  ;;  %3751 = vmatprep.subr.mxu1 %v4704_v37  ;;  %v4904_v32 = vsub.f32 %v2505_v11, %v4901_v44 }
 0x2d0   :  { %3724 = vmatprep.mubr.f32.mxu1 %v1922_v40  ;;  %3738 = vmatpush3.msra.mxu0 %v4771_v30 }
 0x2d1   :  { %3752 = vmatpush3.msra.mxu1 %v4704_v37  ;;  %3739 = vmatprep.subr.mxu0 %v4786_v4  ;;  %v2578_v24 = vand.u32 4294901760, %v4904_v32 }
 0x2d2   :  { %3725 = vmatmul.mubr.f32.gmra.mxu1 %v1932_v18  ;;  %3753 = vmatprep.subr.mxu1 %v4674_v28 }
 0x2d3   :  { %3740 = vmatpush3.msra.mxu0 %v4786_v4  ;;  %3754 = vmatpush3.msra.mxu1 %v4674_v28  ;;  %v3843_v28 = vmov 0.0  }
 0x2d4   :  { %3741 = vmatprep.subr.mxu0 %v4796_v55  ;;  %3755 = vmatprep.subr.mxu1 %v4680_v51 }
 0x2d5   :  { %3742 = vmatpush3.msra.mxu0 %v4796_v55  ;;  %3743 = vmatprep.mubr.f32.mxu0 %v5015_v25 }
 0x2d6   :  { %3756 = vmatpush3.msra.mxu1 %v4680_v51  ;;  %3744 = vmatmul.mubr.f32.vlgmr.msra.gmra.mxu0 %v4678_v35 }
 0x2d7   :  { %3757 = vmatprep.subr.mxu1 %v4682_v58  ;;  %3746 = vmatprep.mubr.f32.mxu0 %v4694_v33 }
 0x2d8   :  { %3758 = vmatpush3.msra.mxu1 %v4682_v58  ;;  %3765 = vmatprep.mubr.f32.mxu1 %v5015_v25 }
 0x2d9   :  { %3759 = vmatprep.subr.mxu1 %v4696_v39  ;;  %3771 = vmatprep.subr.mxu0 %v3843_v28 }
 0x2da   :  { %3760 = vmatpush3.msra.mxu1 %v4696_v39  ;;  %3747 = vmatmul.mubr.f32.gmra.mxu0 %v4709_v49 }
 0x2db   :  { %3761 = vmatprep.subr.mxu1 %v4724_v26  ;;  %3779 = vmatprep.mubr.msk.f32.mxu0 %vm3844_vm3, %v3843_v28 }
 0x2dc   :  { %3762 = vmatpush3.msra.mxu1 %v4724_v26 }
 0x2dd   :  { %3763 = vmatprep.subr.mxu1 %v4744_v6 }
 0x2de   :  { %3764 = vmatpush3.msra.mxu1 %v4744_v6 }
 0x2df   :  { %3766 = vmatmul.mubr.f32.vlgmr.msra.gmra.mxu1 %v4678_v35  ;;  %3782 = vmatprep.subr.mxu1 %v3843_v28 }
 0x2e0   :  { %3768 = vmatprep.mubr.f32.mxu1 %v4694_v33 }
 0x2e3   :  { %3769 = vmatmul.mubr.f32.gmra.mxu1 %v4709_v49 }
 0x2e4   :  { %3790 = vmatprep.mubr.msk.f32.mxu1 %vm3844_vm3, %v3843_v28 }
 0x36f   :  { %v3657_v51 = vpop.f32.mrf.mxu0 }
 0x370   :  { %v1917_v49 = vadd.f32 %v3657_v51, %v1802_v38 }
 0x371   :  { %v1906_v52 = vpop.f32.mrf.mxu0 }
 0x372   :  { %v1907_v53 = vadd.f32 %v1906_v52, %v1797_v29 }
 0x374   :  { %v3660_v54 = vpop.f32.mrf.mxu0 }
 0x375   :  { %v1937_v63 = vadd.f32 %v3660_v54, %v1812_v46  ;;  %v2579_v54 = vsub.f32 %v4904_v32, %v2578_v24 }
 0x376   :  { %v1926_v58 = vpop.f32.mrf.mxu0 }
 0x377   :  { %v1927_v6 = vadd.f32 %v1926_v58, %v1807_v27  ;;  %v2580_v46 = vand.u32 4294901760, %v2579_v54 }
 0x378   :  { %v3679_v35 = vpop.f32.mrf.mxu1 }
 0x379   :  { %v2054_v26 = vadd.f32 %v3679_v35, %v1917_v49 }
 0x37a   :  { %v2047_v0 = vpop.f32.mrf.mxu1 }
 0x37b   :  { %v2048_v3 = vadd.f32 %v2047_v0, %v1907_v53 }
 0x37e   :  { %v3682_v22 = vpop.f32.mrf.mxu1 }
 0x37f   :  { %v2066_v61 = vadd.f32 %v3682_v22, %v1937_v63  ;;  %v2502_v63 = vpop.permute.xlu0 %2501 }
 0x380   :  { %v2059_v33 = vpop.f32.mrf.mxu1 }
 0x381   :  { %v2060_v40 = vadd.f32 %v2059_v33, %v1927_v6 }
 0x382   :  { %v3701_v19 = vpop.f32.mrf.mxu0 }
 0x383   :  { %v2161_v57 = vadd.f32 %v3701_v19, %v2054_v26 }
 0x384   :  { %v2153_v43 = vpop.f32.mrf.mxu0 }
 0x385   :  { %v2154_v12 = vadd.f32 %v2153_v43, %v2048_v3 }
 0x388   :  { %v3704_v39 = vpop.f32.mrf.mxu0 }
 0x389   :  { %v2175_v16 = vadd.f32 %v3704_v39, %v2066_v61 }
 0x38a   :  { %v2167_v37 = vpop.f32.mrf.mxu0 }
 0x38b   :  { %v2168_v48 = vadd.f32 %v2167_v37, %v2060_v40 }
 0x38c   :  { %v3723_v5 = vpop.f32.mrf.mxu1 }
 0x38d   :  { %v2264_v41 = vadd.f32 %v3723_v5, %v2161_v57 }
 0x38e   :  { %v2255_v1 = vpop.f32.mrf.mxu1 }
 0x38f   :  { %v2256_v23 = vadd.f32 %v2255_v1, %v2154_v12 }
 0x392   :  { %v3726_v47 = vpop.f32.mrf.mxu1 }
 0x393   :  { %v2280_v18 = vadd.f32 %v3726_v47, %v2175_v16 }
 0x394   :  { %v2271_v50 = vpop.f32.mrf.mxu1 }
 0x395   :  { %v2272_v17 = vadd.f32 %v2271_v50, %v2168_v48 }
 0x396   :  { %v3745_v62 = vpop.f32.mrf.mxu0 }
 0x397   :  { %v2381_v36 = vadd.f32 %v3745_v62, %v2264_v41 }
 0x398   :  { %v2374_v34 = vpop.f32.mrf.mxu0 }
 0x399   :  { %v2375_v15 = vadd.f32 %v2374_v34, %v2256_v23 }
 0x39a   :  { %v3748_v14 = vpop.f32.mrf.mxu0 }
 0x39b   :  { %v2393_v59 = vadd.f32 %v3748_v14, %v2280_v18 }
 0x39c   :  { %v2386_v7 = vpop.f32.mrf.mxu0 }
 0x39d   :  { %v2387_v45 = vadd.f32 %v2386_v7, %v2272_v17 }
 0x39f   :  { %v3767_v30 = vpop.f32.mrf.mxu1 }
 0x3a0   :  { %v2478_v8 = vadd.f32 %v3767_v30, %v2381_v36 }
 0x3a1   :  { %v2471_v4 = vpop.f32.mrf.mxu1 }
 0x3a2   :  { %v2494_v31 = vmax.f32 %v2478_v8, 0.0  ;;  %v2472_v55 = vadd.f32 %v2471_v4, %v2375_v15 }
 0x3a3   :  { %v3770_v60 = vpop.f32.mrf.mxu1 }
 0x3a4   :  { %v4906_v56 = vand.u32 4294901760, %v2494_v31  ;;  %v2493_v20 = vmax.f32 %v2472_v55, 0.0  ;;  %v2490_v10 = vadd.f32 %v3770_v60, %v2393_v59 }
 0x3a5   :  { %v2483_v21 = vpop.f32.mrf.mxu1 }
 0x3a6   :  { %v4909_v2 = vand.u32 4294901760, %v2493_v20  ;;  %v2496_v13 = vmax.f32 %v2490_v10, 0.0  ;;  %v2484_v42 = vadd.f32 %v2483_v21, %v2387_v45  ;;  %v2626_v25 = vsub.f32 %v2494_v31, %v4906_v56 }
 0x3a8   :  { %v4912_v51 = vand.u32 4294901760, %v2496_v13  ;;  %v2495_v52 = vmax.f32 %v2484_v42, 0.0  ;;  %v2633_v35 = vsub.f32 %v2493_v20, %v4909_v2  ;;  %v2627_v19 = vand.u32 4294901760, %v2626_v25 }
 0x3aa   :  { %v2612_v58 = vsub.f32 %v2496_v13, %v4912_v51  ;;  %v4919_v0 = vand.u32 4294901760, %v2495_v52  ;;  %3772 = vmatpush3.msra.mxu0 %v4912_v51  ;;  %v2634_v33 = vand.u32 4294901760, %v2633_v35  ;;  %v2628_v5 = vsub.f32 %v2626_v25, %v2627_v19 }
 0x3ab   :  { %3773 = vmatprep.subr.mxu0 %v3843_v28 }
 0x3ac   :  { %v2613_v22 = vand.u32 4294901760, %v2612_v58  ;;  %v2619_v43 = vsub.f32 %v2495_v52, %v4919_v0  ;;  %3774 = vmatpush3.msra.mxu0 %v4919_v0  ;;  %v2635_v1 = vsub.f32 %v2633_v35, %v2634_v33  ;;  %v2629_v62 = vand.u32 4294901760, %v2628_v5 }
 0x3ad   :  { %3775 = vmatprep.subr.mxu0 %v3843_v28 }
 0x3ae   :  { %v2614_v39 = vsub.f32 %v2612_v58, %v2613_v22  ;;  %v2620_v27 = vand.u32 4294901760, %v2619_v43  ;;  %3776 = vmatpush3.msra.mxu0 %v4906_v56  ;;  %v2636_v29 = vand.u32 4294901760, %v2635_v1 }
 0x3af   :  { %3777 = vmatprep.subr.mxu0 %v3843_v28 }
 0x3b0   :  { %v2621_v37 = vsub.f32 %v2619_v43, %v2620_v27  ;;  %3778 = vmatpush3.msra.mxu0 %v4909_v2  ;;  %v2615_v38 = vand.u32 4294901760, %v2614_v39 }
 0x3b1   :  { %3780 = vmatmul.mubr.f32.vlgmr.msra.gmra.mxu0 %v2580_v46  ;;  %3793 = vmatprep.subr.mxu0 %v3843_v28 }
 0x3b2   :  { %3783 = vmatpush3.msra.mxu1 %v2615_v38  ;;  %3794 = vmatpush3.msra.mxu0 %v2612_v58  ;;  %v2622_v49 = vand.u32 4294901760, %v2621_v37 }
 0x3b3   :  { %3784 = vmatprep.subr.mxu1 %v3843_v28  ;;  %3795 = vmatprep.subr.mxu0 %v3843_v28 }
 0x3b4   :  { %3785 = vmatpush3.msra.mxu1 %v2622_v49  ;;  %3796 = vmatpush3.msra.mxu0 %v2619_v43 }
 0x3b5   :  { %3786 = vmatprep.subr.mxu1 %v3843_v28  ;;  %3797 = vmatprep.subr.mxu0 %v3843_v28 }
 0x3b6   :  { %3787 = vmatpush3.msra.mxu1 %v2629_v62  ;;  %3798 = vmatpush3.msra.mxu0 %v2626_v25 }
 0x3b7   :  { %3788 = vmatprep.subr.mxu1 %v3843_v28  ;;  %3799 = vmatprep.subr.mxu0 %v3843_v28 }
 0x3b8   :  { %3789 = vmatpush3.msra.mxu1 %v2636_v29  ;;  %3800 = vmatpush3.msra.mxu0 %v2633_v35 }
 0x3b9   :  { %3791 = vmatmul.mubr.f32.vlgmr.msra.gmra.mxu1 %v4901_v44  ;;  %3801 = vmatprep.mubr.msk.f32.mxu0 %vm3844_vm3, %v3843_v28 }
 0x3ba   :  { %3804 = vmatprep.subr.mxu1 %v3843_v28  ;;  %3815 = vmatprep.subr.mxu0 %v3843_v28 }
 0x3bb   :  { %3802 = vmatmul.mubr.f32.vlgmr.msra.gmra.mxu0 %v4904_v32  ;;  %3805 = vmatpush3.msra.mxu1 %v4912_v51 }
 0x3bc   :  { %3816 = vmatpush3.msra.mxu0 %v2613_v22  ;;  %3806 = vmatprep.subr.mxu1 %v3843_v28 }
 0x3bd   :  { %3817 = vmatprep.subr.mxu0 %v3843_v28  ;;  %3807 = vmatpush3.msra.mxu1 %v4919_v0 }
 0x3be   :  { %3818 = vmatpush3.msra.mxu0 %v2620_v27  ;;  %3808 = vmatprep.subr.mxu1 %v3843_v28 }
 0x3bf   :  { %3819 = vmatprep.subr.mxu0 %v3843_v28  ;;  %3809 = vmatpush3.msra.mxu1 %v4906_v56 }
 0x3c0   :  { %3820 = vmatpush3.msra.mxu0 %v2627_v19  ;;  %3810 = vmatprep.subr.mxu1 %v3843_v28 }
 0x3c1   :  { %3821 = vmatprep.subr.mxu0 %v3843_v28  ;;  %3811 = vmatpush3.msra.mxu1 %v4909_v2 }
 0x3c2   :  { %3812 = vmatprep.mubr.msk.f32.mxu1 %vm3844_vm3, %v3843_v28  ;;  %3822 = vmatpush3.msra.mxu0 %v2634_v33 }
 0x3c3   :  { %3813 = vmatmul.mubr.f32.vlgmr.msra.gmra.mxu1 %v2578_v24  ;;  %3826 = vmatprep.subr.mxu1 %v3843_v28 }
 0x3c4   :  { %3823 = vmatprep.mubr.msk.f32.mxu0 %vm3844_vm3, %v3843_v28  ;;  %3827 = vmatpush3.msra.mxu1 %v4912_v51 }
 0x3c5   :  { %3824 = vmatmul.mubr.f32.vlgmr.msra.gmra.mxu0 %v4901_v44  ;;  %3828 = vmatprep.subr.mxu1 %v3843_v28 }
 0x3c6   :  { %3829 = vmatpush3.msra.mxu1 %v4919_v0  ;;  %3834 = vmatprep.mubr.msk.f32.mxu1 %vm3844_vm3, %v3843_v28 }
 0x3c7   :  { %3830 = vmatprep.subr.mxu1 %v3843_v28 }
 0x3c8   :  { %3831 = vmatpush3.msra.mxu1 %v4906_v56 }
 0x3c9   :  { %3832 = vmatprep.subr.mxu1 %v3843_v28 }
 0x3ca   :  { %3833 = vmatpush3.msra.mxu1 %v4909_v2 }
 0x3cb   :  { %3835 = vmatmul.mubr.f32.vlgmr.msra.gmra.mxu1 %v4901_v44 }
 0x471   :  { %v2582_v9 = vpop.f32.mrf.mxu0 }
 0x472   :  { %v2583_v57 = vadd.f32 %v2582_v9, %v2502_v63 }
 0x473   :  { %v3781_v53 = vpop.f32.mrf.mxu0 }
 0x479   :  { %v2673_v26 = vpop.f32.mrf.mxu1 }
 0x47a   :  { %v2674_v11 = vadd.f32 %v2673_v26, %v2583_v57 }
 0x47b   :  { %v3792_v47 = vpop.f32.mrf.mxu1  ;;  %v2753_v34 = vpop.f32.mrf.mxu0 }
 0x47c   :  { %v2754_v61 = vadd.f32 %v2753_v34, %v2674_v11 }
 0x47d   :  { %v3803_v3 = vpop.f32.mrf.mxu0 }
 0x483   :  { %v2830_v6 = vpop.f32.mrf.mxu1 }
 0x484   :  { %v2831_v50 = vadd.f32 %v2830_v6, %v2754_v61 }
 0x485   :  { %v3814_v12 = vpop.f32.mrf.mxu1  ;;  %v2913_v41 = vpop.f32.mrf.mxu0 }
 0x486   :  { %v2914_v28 = vadd.f32 %v2913_v41, %v2831_v50 }
 0x487   :  { %v3825_v14 = vpop.f32.mrf.mxu0 }
 0x48b   :  { %v2988_v40 = vpop.f32.mrf.mxu1 }
 0x48c   :  { %v2989_v16 = vadd.f32 %v2988_v40, %v2914_v28 }
 0x48d   :  { %v3836_v23 = vpop.f32.mrf.mxu1 }
 0x48e   :  { %2992 = vst [vmem:[%s4982_s9] sm:$0x7] %v2989_v16 }

</bundles_post_ra>
